<compile_context>
chip_gen: v6e
topology: v6e:2x2x1
jax: 0.10.0
libtpu: 0.0.40
codegen_flags: <defaults>
</compile_context>

<pallas_src>
import functools

import jax
import jax.numpy as jnp
from jax.experimental import pallas as pl
from jax.experimental.pallas import tpu as pltpu


# ----------------------------------------------------------------------------- helpers

def _vmem_capacity_bytes():
    """Best-effort physical VMEM query; conservative (v7x-sized) default on failure."""
    try:
        info = pltpu.get_tpu_info()
    except Exception:
        return 64 * 1024 * 1024
    for name in ("vmem_capacity_bytes", "vmem_size_bytes", "vmem_bytes"):
        val = getattr(info, name, None)
        if val:
            return int(val)
    return 64 * 1024 * 1024


def _pick_q_tile(seq_len, cap):
    for t in (512, 256, 128):
        if t <= cap and seq_len % t == 0:
            return t
    return seq_len


def _probe_copy_kernel(x_ref, o_ref):
    o_ref[...] = x_ref[...]


@functools.lru_cache(maxsize=None)
def _single_buffering_supported():
    """Narrow capability probe for pl.Buffered(1) on a trivial kernel.

    Keeps real compile/runtime errors of the encoder kernel visible (no try/except around
    it) while still degrading gracefully on Pallas builds without single-buffering.
    """
    try:
        fn = pl.pallas_call(
            _probe_copy_kernel,
            out_shape=jax.ShapeDtypeStruct((8, 128), jnp.float32),
            grid=(1,),
            in_specs=[pl.BlockSpec((8, 128), lambda i: (0, 0),
                                   pipeline_mode=pl.Buffered(1))],
            out_specs=pl.BlockSpec((8, 128), lambda i: (0, 0)),
        )
        jax.block_until_ready(fn(jnp.zeros((8, 128), jnp.float32)))
        return True
    except Exception:
        return False


# ----------------------------------------------------------------------------- kernel

def _make_kernel(d_model, heads, seq_len, q_tile):
    dh = d_model // heads
    scale = 1.0 / (dh ** 0.5)
    eps = 1e-6
    bf16 = jnp.bfloat16

    def layer_norm(v, g, b):
        mu = jnp.mean(v, axis=-1, keepdims=True)
        var = jnp.mean((v - mu) ** 2, axis=-1, keepdims=True)
        inv = jax.lax.rsqrt(var + eps)
        return (v - mu) * inv * g + b

    def kernel(xkv_ref, bias_ref,
               ln1_g_ref, ln1_b_ref,
               wq_ref, bq_ref, wk_ref, bk_ref, wv_ref, bv_ref,
               wo_ref, bo_ref,
               ln2_g_ref, ln2_b_ref,
               w1_ref, b1_ref, w2_ref, b2_ref,
               o_ref,
               kt_scr, v_scr, ctx_scr):
        qi = pl.program_id(1)

        # ---- K / V for this batch element: projected once, cached HEAD-MAJOR in VMEM ----
        @pl.when(qi == 0)
        def _():
            xn_kv = layer_norm(xkv_ref[0], ln1_g_ref[...], ln1_b_ref[...]).astype(bf16)
            k = jnp.dot(xn_kv, wk_ref[...], preferred_element_type=jnp.float32) + bk_ref[...]
            v = jnp.dot(xn_kv, wv_ref[...], preferred_element_type=jnp.float32) + bv_ref[...]
            kt = k.astype(bf16).T                      # cast BEFORE transpose: half the XLU bytes
            vb = v.astype(bf16)
            for h in range(heads):                     # once per batch element (amortized over qi)
                sl = slice(h * dh, (h + 1) * dh)
                kt_scr[h] = kt[sl, :]                  # (dh, S)   sublane-aligned slice
                v_scr[h] = vb[:, sl]                   # (S, dh)   NOTE: lanes pad to 128 if dh<128

        # ---- self-attention sublayer (pre-norm) on this query tile ----
        q_start = pl.multiple_of(qi * q_tile, q_tile)
        x = xkv_ref[0, pl.ds(q_start, q_tile), :]                  # (tq, D) f32, residual source
        xn = layer_norm(x, ln1_g_ref[...], ln1_b_ref[...]).astype(bf16)
        q = jnp.dot(xn, wq_ref[...], preferred_element_type=jnp.float32) + bq_ref[...]
        q = (q * scale).astype(bf16)                               # scale once, outside head loop

        # Additive key-mask bias: precomputed in the wrapper (0 valid / -1e9 pad); hoist the
        # (1,S)->(tq,S) broadcast out of the head loop (JAX does not CSE broadcast_in_dim).
        # NOTE: for a fully-padded query row this gives softmax(raw scores) instead of the
        # exactly-uniform masked_fill(-1e18) result; such rows are discarded downstream.
        bias_tile = jnp.broadcast_to(bias_ref[0], (q_tile, seq_len))

        for h in range(heads):                                     # static unroll (small H)
            sl = slice(h * dh, (h + 1) * dh)
            scores = jnp.dot(q[:, sl], kt_scr[h],
                             preferred_element_type=jnp.float32) + bias_tile    # (tq, S) f32
            m = jnp.max(scores, axis=-1, keepdims=True)
            p = jnp.exp(scores - m)
            denom = jnp.sum(p, axis=-1, keepdims=True)
            ctx_h = jnp.dot(p.astype(bf16), v_scr[h],
                            preferred_element_type=jnp.float32)                 # (tq, dh) f32
            # Deferred softmax normalization on the (otherwise idle) EUP; write straight into
            # the ctx scratch slice -> no jnp.concatenate, bounded live ranges.
            ctx_scr[:, sl] = ctx_h * pl.reciprocal(denom, approx=True)

        # Single fused output projection (K = D on the MXU), bias added once.
        attn_out = jnp.dot(ctx_scr[...].astype(bf16), wo_ref[...],
                           preferred_element_type=jnp.float32) + bo_ref[...]
        x1 = x + attn_out                                          # dropout == identity (eval)

        # ---- feed-forward sublayer (pre-norm) ----
        xn2 = layer_norm(x1, ln2_g_ref[...], ln2_b_ref[...]).astype(bf16)
        hid = jnp.dot(xn2, w1_ref[...], preferred_element_type=jnp.float32) + b1_ref[...]
        hid = jnp.maximum(hid, 0.0).astype(bf16)
        ffn = jnp.dot(hid, w2_ref[...], preferred_element_type=jnp.float32) + b2_ref[...]

        o_ref[0] = (x1 + ffn).astype(o_ref.dtype)

    return kernel


# ----------------------------------------------------------------------------- wrapper

def transformer_encoder_layer(x, mask, params, *, heads, out_dtype=jnp.float32):
    """x: (B, S, D) f32, mask: (B, 1, S) f32 (1.0 = pad key). Returns (B, S, D) out_dtype."""
    B, S, D = x.shape
    assert D % heads == 0, "d_model must be divisible by heads"
    d_ff = params["w1"].shape[1]
    dh = D // heads
    bf16 = jnp.bfloat16

    # Generation-aware tiling: small-VMEM chips (v7x, 64 MiB) get tq<=256 and a tighter
    # scoped limit; big-VMEM chips (v5e/v6e, 128 MiB) get tq<=512 and a 96 MiB limit.
    vmem_cap = _vmem_capacity_bytes()
    small_vmem = vmem_cap < 96 * 1024 * 1024
    tq = _pick_q_tile(S, 256 if small_vmem else 512)
    vmem_limit = (56 if small_vmem else 96) * 1024 * 1024
    n_q = S // tq if S % tq == 0 else 1

    kernel = _make_kernel(D, heads, S, tq)
    single_buf = _single_buffering_supported()

    def spec(shape, index_map, *, single):
        if single and single_buf:
            return pl.BlockSpec(shape, index_map, pipeline_mode=pl.Buffered(1))
        return pl.BlockSpec(shape, index_map)

    # Constant-index weights / biases: never re-DMA'd across grid steps -> single-buffer
    # them to halve their resident VMEM (the biggest knob for fitting v7x's 64 MiB).
    def wspec(shape):
        return spec(shape, lambda b, qi: (0, 0), single=True)

    in_specs = [
        # Full-sequence x: K/V source AND query-tile source (sliced in-kernel). Constant
        # across qi -> single-buffer; refill at batch boundaries is hidden by n_q steps.
        spec((1, S, D), lambda b, qi: (b, 0, 0), single=True),
        pl.BlockSpec((1, 1, S), lambda b, qi: (b, 0, 0)),       # additive key-mask bias
        wspec((1, D)), wspec((1, D)),                           # ln1 gamma/beta
        wspec((D, D)), wspec((1, D)),                           # Wq, bq
        wspec((D, D)), wspec((1, D)),                           # Wk, bk
        wspec((D, D)), wspec((1, D)),                           # Wv, bv
        wspec((D, D)), wspec((1, D)),                           # Wo, bo
        wspec((1, D)), wspec((1, D)),                           # ln2 gamma/beta
        wspec((D, d_ff)), wspec((1, d_ff)),                     # W1, b1
        wspec((d_ff, D)), wspec((1, D)),                        # W2, b2
    ]

    layer = pl.pallas_call(
        kernel,
        out_shape=jax.ShapeDtypeStruct((B, S, D), out_dtype),
        grid=(B, n_q),
        in_specs=in_specs,
        out_specs=pl.BlockSpec((1, tq, D), lambda b, qi: (b, qi, 0)),
        scratch_shapes=[
            pltpu.VMEM((heads, dh, S), bf16),       # K^T cache, head-major (per batch element)
            pltpu.VMEM((heads, S, dh), bf16),       # V cache, head-major
            pltpu.VMEM((tq, D), jnp.float32),       # per-tile context accumulator
        ],
        compiler_params=pltpu.CompilerParams(
            dimension_semantics=("parallel", "arbitrary"),
            vmem_limit_bytes=vmem_limit,
        ),
    )

    # Additive key bias precomputed in the wrapper (tiny): 0.0 valid, -1e9 padded.
    attn_bias = jnp.where(mask > 0.5, jnp.float32(-1e9), jnp.float32(0.0))

    return layer(
        x, attn_bias,
        params["ln1_g"], params["ln1_b"],
        params["wq"].astype(bf16), params["bq"],
        params["wk"].astype(bf16), params["bk"],
        params["wv"].astype(bf16), params["bv"],
        params["wo"].astype(bf16), params["bo"],
        params["ln2_g"], params["ln2_b"],
        params["w1"].astype(bf16), params["b1"],
        params["w2"].astype(bf16), params["b2"],
    )


# ----------------------------------------------------------------------------- reference

def reference(x, mask, params, *, heads):
    """Pure-JAX f32 reference of the original module's forward (spec semantics)."""
    B, S, D = x.shape
    dh = D // heads

    def ln(v, g, b):
        mu = jnp.mean(v, -1, keepdims=True)
        var = jnp.mean((v - mu) ** 2, -1, keepdims=True)
        return (v - mu) * jax.lax.rsqrt(var + 1e-6) * g + b

    xn = ln(x, params["ln1_g"], params["ln1_b"])
    q = xn @ params["wq"] + params["bq"]
    k = xn @ params["wk"] + params["bk"]
    v = xn @ params["wv"] + params["bv"]
    q = q.reshape(B, S, heads, dh).transpose(0, 2, 1, 3) / jnp.sqrt(dh)
    k = k.reshape(B, S, heads, dh).transpose(0, 2, 1, 3)
    v = v.reshape(B, S, heads, dh).transpose(0, 2, 1, 3)
    scores = jnp.einsum("bhqd,bhkd->bhqk", q, k)
    scores = jnp.where(mask[:, None, :, :] > 0.5, -1e18, scores)
    attn = jax.nn.softmax(scores, axis=-1)
    ctx = jnp.einsum("bhqk,bhkd->bhqd", attn, v).transpose(0, 2, 1, 3).reshape(B, S, D)
    x1 = x + ctx @ params["wo"] + params["bo"]
    xn2 = ln(x1, params["ln2_g"], params["ln2_b"])
    ffn = jnp.maximum(xn2 @ params["w1"] + params["b1"], 0.0) @ params["w2"] + params["b2"]
    return x1 + ffn


# ----------------------------------------------------------------------------- demo / test

if __name__ == "__main__":
    B, S, D, H, D_FF = 2, 8, 32, 4, 64

    key = jax.random.PRNGKey(0)
    ks = jax.random.split(key, 16)

    def rnd(k, shape, scale=0.1):
        return (scale * jax.random.normal(k, shape)).astype(jnp.float32)

    # Weights stored as (in, out) — i.e. PyTorch nn.Linear weight transposed.
    params = dict(
        ln1_g=jnp.ones((1, D), jnp.float32), ln1_b=jnp.zeros((1, D), jnp.float32),
        wq=rnd(ks[0], (D, D)), bq=rnd(ks[1], (1, D)),
        wk=rnd(ks[2], (D, D)), bk=rnd(ks[3], (1, D)),
        wv=rnd(ks[4], (D, D)), bv=rnd(ks[5], (1, D)),
        wo=rnd(ks[6], (D, D)), bo=rnd(ks[7], (1, D)),
        ln2_g=jnp.ones((1, D), jnp.float32), ln2_b=jnp.zeros((1, D), jnp.float32),
        w1=rnd(ks[8], (D, D_FF)), b1=rnd(ks[9], (1, D_FF)),
        w2=rnd(ks[10], (D_FF, D)), b2=rnd(ks[11], (1, D)),
    )

    x = rnd(ks[12], (B, S, D), scale=1.0)
    # batch 0: no padding; batch 1: last 2 key positions padded.
    mask = jnp.zeros((B, 1, S), jnp.float32).at[1, 0, -2:].set(1.0)

    out = jax.block_until_ready(transformer_encoder_layer(x, mask, params, heads=H))
    ref = reference(x, mask, params, heads=H)

    assert out.shape == (B, S, D)
    # Kernel uses bf16 matmul operands (f32 accumulation) + approx reciprocal, so compare
    # against the f32 reference with a bf16-appropriate tolerance.
    max_err = float(jnp.max(jnp.abs(out - ref)))
    assert jnp.allclose(out, ref, atol=2e-2, rtol=2e-2), max_err

    print("KERNEL_OK")
</pallas_src>

<mosaic_0001>
module attributes {stable_mosaic.version = 11 : i64} {
  func.func @_probe_copy_kernel(%arg0: i32, %arg1: memref<8x128xf32, #tpu.memory_space<vmem>>, %arg2: memref<8x128xf32, #tpu.memory_space<vmem>>) attributes {dimension_semantics = [#tpu.dimension_semantics<arbitrary>], iteration_bounds = array<i64: 1>, scalar_prefetch = 0 : i64, scratch_operands = 0 : i64, tpu.core_type = #tpu.core_type<tc>, window_params = [{pipeline_mode = #tpu.pipeline_mode<synchronous>, transform_indices = @transform_0, window_bounds = array<i64: 8, 128>}, {pipeline_mode = #tpu.pipeline_mode<synchronous>, transform_indices = @transform_1, window_bounds = array<i64: 8, 128>}]} {
    %c0 = arith.constant 0 : index
    %c0_0 = arith.constant 0 : index
    %0 = vector.load %arg1[%c0, %c0_0] : memref<8x128xf32, #tpu.memory_space<vmem>>, vector<8x128xf32>
    %c0_1 = arith.constant 0 : index
    %c0_2 = arith.constant 0 : index
    %1 = vector.load %arg2[%c0_1, %c0_2] : memref<8x128xf32, #tpu.memory_space<vmem>>, vector<8x128xf32>
    tpu.vector_store %arg2[%c0_1, %c0_2], %0 {strides = array<i32>} : memref<8x128xf32, #tpu.memory_space<vmem>>, vector<8x128xf32>,
    return
  }
  func.func @transform_0(%arg0: i32) -> (i32, i32) {
    %c0_i32 = arith.constant 0 : i32
    %c0_i32_0 = arith.constant 0 : i32
    %c0_i32_1 = arith.constant 0 : i32
    return %c0_i32, %c0_i32_0 : i32, i32
  }
  func.func @transform_1(%arg0: i32) -> (i32, i32) {
    %c0_i32 = arith.constant 0 : i32
    %c0_i32_0 = arith.constant 0 : i32
    %c0_i32_1 = arith.constant 0 : i32
    return %c0_i32, %c0_i32_0 : i32, i32
  }
}

module attributes {stable_mosaic.version = 11 : i64} {
  func.func @kernel(%arg0: i32, %arg1: i32, %arg2: memref<1x8x32xf32, #tpu.memory_space<vmem>>, %arg3: memref<1x1x8xf32, #tpu.memory_space<vmem>>, %arg4: memref<1x32xf32, #tpu.memory_space<vmem>>, %arg5: memref<1x32xf32, #tpu.memory_space<vmem>>, %arg6: memref<32x32xbf16, #tpu.memory_space<vmem>>, %arg7: memref<1x32xf32, #tpu.memory_space<vmem>>, %arg8: memref<32x32xbf16, #tpu.memory_space<vmem>>, %arg9: memref<1x32xf32, #tpu.memory_space<vmem>>, %arg10: memref<32x32xbf16, #tpu.memory_space<vmem>>, %arg11: memref<1x32xf32, #tpu.memory_space<vmem>>, %arg12: memref<32x32xbf16, #tpu.memory_space<vmem>>, %arg13: memref<1x32xf32, #tpu.memory_space<vmem>>, %arg14: memref<1x32xf32, #tpu.memory_space<vmem>>, %arg15: memref<1x32xf32, #tpu.memory_space<vmem>>, %arg16: memref<32x64xbf16, #tpu.memory_space<vmem>>, %arg17: memref<1x64xf32, #tpu.memory_space<vmem>>, %arg18: memref<64x32xbf16, #tpu.memory_space<vmem>>, %arg19: memref<1x32xf32, #tpu.memory_space<vmem>>, %arg20: memref<1x8x32xf32, #tpu.memory_space<vmem>>, %arg21: memref<4x8x8xbf16, #tpu.memory_space<vmem>>, %arg22: memref<4x8x8xbf16, #tpu.memory_space<vmem>>, %arg23: memref<8x32xf32, #tpu.memory_space<vmem>>) attributes {dimension_semantics = [#tpu.dimension_semantics<parallel>, #tpu.dimension_semantics<arbitrary>], iteration_bounds = array<i64: 2, 1>, scalar_prefetch = 0 : i64, scratch_operands = 3 : i64, tpu.core_type = #tpu.core_type<tc>, window_params = [{transform_indices = @transform_0, window_bounds = array<i64: 1, 8, 32>}, {transform_indices = @transform_1, window_bounds = array<i64: 1, 1, 8>}, {pipeline_mode = #tpu.pipeline_mode<synchronous>, transform_indices = @transform_2, window_bounds = array<i64: 1, 32>}, {pipeline_mode = #tpu.pipeline_mode<synchronous>, transform_indices = @transform_3, window_bounds = array<i64: 1, 32>}, {pipeline_mode = #tpu.pipeline_mode<synchronous>, transform_indices = @transform_4, window_bounds = array<i64: 32, 32>}, {pipeline_mode = #tpu.pipeline_mode<synchronous>, transform_indices = @transform_5, window_bounds = array<i64: 1, 32>}, {pipeline_mode = #tpu.pipeline_mode<synchronous>, transform_indices = @transform_6, window_bounds = array<i64: 32, 32>}, {pipeline_mode = #tpu.pipeline_mode<synchronous>, transform_indices = @transform_7, window_bounds = array<i64: 1, 32>}, {pipeline_mode = #tpu.pipeline_mode<synchronous>, transform_indices = @transform_8, window_bounds = array<i64: 32, 32>}, {pipeline_mode = #tpu.pipeline_mode<synchronous>, transform_indices = @transform_9, window_bounds = array<i64: 1, 32>}, {pipeline_mode = #tpu.pipeline_mode<synchronous>, transform_indices = @transform_10, window_bounds = array<i64: 32, 32>}, {pipeline_mode = #tpu.pipeline_mode<synchronous>, transform_indices = @transform_11, window_bounds = array<i64: 1, 32>}, {pipeline_mode = #tpu.pipeline_mode<synchronous>, transform_indices = @transform_12, window_bounds = array<i64: 1, 32>}, {pipeline_mode = #tpu.pipeline_mode<synchronous>, transform_indices = @transform_13, window_bounds = array<i64: 1, 32>}, {pipeline_mode = #tpu.pipeline_mode<synchronous>, transform_indices = @transform_14, window_bounds = array<i64: 32, 64>}, {pipeline_mode = #tpu.pipeline_mode<synchronous>, transform_indices = @transform_15, window_bounds = array<i64: 1, 64>}, {pipeline_mode = #tpu.pipeline_mode<synchronous>, transform_indices = @transform_16, window_bounds = array<i64: 64, 32>}, {pipeline_mode = #tpu.pipeline_mode<synchronous>, transform_indices = @transform_17, window_bounds = array<i64: 1, 32>}, {transform_indices = @transform_18, window_bounds = array<i64: 1, 8, 32>}]} {
    %c0_i32 = arith.constant 0 : i32
    %0 = arith.cmpi eq, %arg1, %c0_i32 : i32
    %1 = arith.extui %0 : i1 to i32
    %c0_i32_0 = arith.constant 0 : i32
    %2 = arith.cmpi ne, %1, %c0_i32_0 : i32
    scf.if %2 {
      %c0_91 = arith.constant 0 : index
      %c0_92 = arith.constant 0 : index
      %c0_93 = arith.constant 0 : index
      %175 = vector.load %arg2[%c0_91, %c0_92, %c0_93] : memref<1x8x32xf32, #tpu.memory_space<vmem>>, vector<1x8x32xf32>
      %176 = vector.shape_cast %175 : vector<1x8x32xf32> to vector<8x32xf32>
      %c0_94 = arith.constant 0 : index
      %c0_95 = arith.constant 0 : index
      %177 = vector.load %arg4[%c0_94, %c0_95] : memref<1x32xf32, #tpu.memory_space<vmem>>, vector<1x32xf32>
      %c0_96 = arith.constant 0 : index
      %c0_97 = arith.constant 0 : index
      %178 = vector.load %arg5[%c0_96, %c0_97] : memref<1x32xf32, #tpu.memory_space<vmem>>, vector<1x32xf32>
      %cst_98 = arith.constant dense<0.000000e+00> : vector<8xf32>
      %179 = vector.multi_reduction <add>, %176, %cst_98 [1] : vector<8x32xf32> to vector<8xf32>
      %180 = vector.shape_cast %179 : vector<8xf32> to vector<8x1xf32>
      %cst_99 = arith.constant 3.200000e+01 : f32
      %181 = vector.broadcast %cst_99 : f32 to vector<8x1xf32>
      %182 = arith.divf %180, %181 : vector<8x1xf32>
      %183 = vector.broadcast %182 : vector<8x1xf32> to vector<8x32xf32>
      %184 = arith.subf %176, %183 : vector<8x32xf32>
      %185 = arith.mulf %184, %184 : vector<8x32xf32>
      %cst_100 = arith.constant dense<0.000000e+00> : vector<8xf32>
      %186 = vector.multi_reduction <add>, %185, %cst_100 [1] : vector<8x32xf32> to vector<8xf32>
      %187 = vector.shape_cast %186 : vector<8xf32> to vector<8x1xf32>
      %cst_101 = arith.constant 3.200000e+01 : f32
      %188 = vector.broadcast %cst_101 : f32 to vector<8x1xf32>
      %189 = arith.divf %187, %188 : vector<8x1xf32>
      %cst_102 = arith.constant 9.99999997E-7 : f32
      %190 = vector.broadcast %cst_102 : f32 to vector<8x1xf32>
      %191 = arith.addf %189, %190 : vector<8x1xf32>
      %192 = math.rsqrt %191 : vector<8x1xf32>
      %193 = vector.broadcast %182 : vector<8x1xf32> to vector<8x32xf32>
      %194 = arith.subf %176, %193 : vector<8x32xf32>
      %195 = vector.broadcast %192 : vector<8x1xf32> to vector<8x32xf32>
      %196 = arith.mulf %194, %195 : vector<8x32xf32>
      %197 = vector.broadcast %177 : vector<1x32xf32> to vector<8x32xf32>
      %198 = arith.mulf %196, %197 : vector<8x32xf32>
      %199 = vector.broadcast %178 : vector<1x32xf32> to vector<8x32xf32>
      %200 = arith.addf %198, %199 : vector<8x32xf32>
      %201 = arith.truncf %200 : vector<8x32xf32> to vector<8x32xbf16>
      %c0_103 = arith.constant 0 : index
      %c0_104 = arith.constant 0 : index
      %202 = vector.load %arg8[%c0_103, %c0_104] : memref<32x32xbf16, #tpu.memory_space<vmem>>, vector<32x32xbf16>
      %cst_105 = arith.constant dense<0.000000e+00> : vector<8x32xf32>
      %203 = tpu.matmul %201, %202, %cst_105 {dimension_numbers = #tpu.dot_dimension_numbers<[1], [0], [0], [1], [0, 0, 1, 1], [], []>} : vector<8x32xbf16>, vector<32x32xbf16>, vector<8x32xf32> -> vector<8x32xf32>
      %c0_106 = arith.constant 0 : index
      %c0_107 = arith.constant 0 : index
      %204 = vector.load %arg9[%c0_106, %c0_107] : memref<1x32xf32, #tpu.memory_space<vmem>>, vector<1x32xf32>
      %205 = vector.broadcast %204 : vector<1x32xf32> to vector<8x32xf32>
      %206 = arith.addf %203, %205 : vector<8x32xf32>
      %c0_108 = arith.constant 0 : index
      %c0_109 = arith.constant 0 : index
      %207 = vector.load %arg10[%c0_108, %c0_109] : memref<32x32xbf16, #tpu.memory_space<vmem>>, vector<32x32xbf16>
      %cst_110 = arith.constant dense<0.000000e+00> : vector<8x32xf32>
      %208 = tpu.matmul %201, %207, %cst_110 {dimension_numbers = #tpu.dot_dimension_numbers<[1], [0], [0], [1], [0, 0, 1, 1], [], []>} : vector<8x32xbf16>, vector<32x32xbf16>, vector<8x32xf32> -> vector<8x32xf32>
      %c0_111 = arith.constant 0 : index
      %c0_112 = arith.constant 0 : index
      %209 = vector.load %arg11[%c0_111, %c0_112] : memref<1x32xf32, #tpu.memory_space<vmem>>, vector<1x32xf32>
      %210 = vector.broadcast %209 : vector<1x32xf32> to vector<8x32xf32>
      %211 = arith.addf %208, %210 : vector<8x32xf32>
      %212 = arith.truncf %206 : vector<8x32xf32> to vector<8x32xbf16>
      %213 = tpu.transpose %212, [1, 0] : vector<8x32xbf16> -> vector<32x8xbf16>
      %214 = arith.truncf %211 : vector<8x32xf32> to vector<8x32xbf16>
      %215 = vector.extract_strided_slice %213 {offsets = [0, 0], sizes = [8, 8], strides = [1, 1]} : vector<32x8xbf16> to vector<8x8xbf16>
      %c0_113 = arith.constant 0 : index
      %c0_114 = arith.constant 0 : index
      %c0_115 = arith.constant 0 : index
      %216 = vector.load %arg21[%c0_113, %c0_114, %c0_115] : memref<4x8x8xbf16, #tpu.memory_space<vmem>>, vector<1x8x8xbf16>
      %217 = vector.shape_cast %216 : vector<1x8x8xbf16> to vector<8x8xbf16>
      %218 = vector.shape_cast %215 : vector<8x8xbf16> to vector<1x8x8xbf16>
      tpu.vector_store %arg21[%c0_113, %c0_114, %c0_115], %218 {strides = array<i32>} : memref<4x8x8xbf16, #tpu.memory_space<vmem>>, vector<1x8x8xbf16>,
      %219 = vector.extract_strided_slice %214 {offsets = [0, 0], sizes = [8, 8], strides = [1, 1]} : vector<8x32xbf16> to vector<8x8xbf16>
      %c0_116 = arith.constant 0 : index
      %c0_117 = arith.constant 0 : index
      %c0_118 = arith.constant 0 : index
      %220 = vector.load %arg22[%c0_116, %c0_117, %c0_118] : memref<4x8x8xbf16, #tpu.memory_space<vmem>>, vector<1x8x8xbf16>
      %221 = vector.shape_cast %220 : vector<1x8x8xbf16> to vector<8x8xbf16>
      %222 = vector.shape_cast %219 : vector<8x8xbf16> to vector<1x8x8xbf16>
      tpu.vector_store %arg22[%c0_116, %c0_117, %c0_118], %222 {strides = array<i32>} : memref<4x8x8xbf16, #tpu.memory_space<vmem>>, vector<1x8x8xbf16>,
      %223 = vector.extract_strided_slice %213 {offsets = [8, 0], sizes = [8, 8], strides = [1, 1]} : vector<32x8xbf16> to vector<8x8xbf16>
      %c1_119 = arith.constant 1 : index
      %c0_120 = arith.constant 0 : index
      %c0_121 = arith.constant 0 : index
      %224 = vector.load %arg21[%c1_119, %c0_120, %c0_121] : memref<4x8x8xbf16, #tpu.memory_space<vmem>>, vector<1x8x8xbf16>
      %225 = vector.shape_cast %224 : vector<1x8x8xbf16> to vector<8x8xbf16>
      %226 = vector.shape_cast %223 : vector<8x8xbf16> to vector<1x8x8xbf16>
      tpu.vector_store %arg21[%c1_119, %c0_120, %c0_121], %226 {strides = array<i32>} : memref<4x8x8xbf16, #tpu.memory_space<vmem>>, vector<1x8x8xbf16>,
      %227 = vector.extract_strided_slice %214 {offsets = [0, 8], sizes = [8, 8], strides = [1, 1]} : vector<8x32xbf16> to vector<8x8xbf16>
      %c1_122 = arith.constant 1 : index
      %c0_123 = arith.constant 0 : index
      %c0_124 = arith.constant 0 : index
      %228 = vector.load %arg22[%c1_122, %c0_123, %c0_124] : memref<4x8x8xbf16, #tpu.memory_space<vmem>>, vector<1x8x8xbf16>
      %229 = vector.shape_cast %228 : vector<1x8x8xbf16> to vector<8x8xbf16>
      %230 = vector.shape_cast %227 : vector<8x8xbf16> to vector<1x8x8xbf16>
      tpu.vector_store %arg22[%c1_122, %c0_123, %c0_124], %230 {strides = array<i32>} : memref<4x8x8xbf16, #tpu.memory_space<vmem>>, vector<1x8x8xbf16>,
      %231 = vector.extract_strided_slice %213 {offsets = [16, 0], sizes = [8, 8], strides = [1, 1]} : vector<32x8xbf16> to vector<8x8xbf16>
      %c2_125 = arith.constant 2 : index
      %c0_126 = arith.constant 0 : index
      %c0_127 = arith.constant 0 : index
      %232 = vector.load %arg21[%c2_125, %c0_126, %c0_127] : memref<4x8x8xbf16, #tpu.memory_space<vmem>>, vector<1x8x8xbf16>
      %233 = vector.shape_cast %232 : vector<1x8x8xbf16> to vector<8x8xbf16>
      %234 = vector.shape_cast %231 : vector<8x8xbf16> to vector<1x8x8xbf16>
      tpu.vector_store %arg21[%c2_125, %c0_126, %c0_127], %234 {strides = array<i32>} : memref<4x8x8xbf16, #tpu.memory_space<vmem>>, vector<1x8x8xbf16>,
      %235 = vector.extract_strided_slice %214 {offsets = [0, 16], sizes = [8, 8], strides = [1, 1]} : vector<8x32xbf16> to vector<8x8xbf16>
      %c2_128 = arith.constant 2 : index
      %c0_129 = arith.constant 0 : index
      %c0_130 = arith.constant 0 : index
      %236 = vector.load %arg22[%c2_128, %c0_129, %c0_130] : memref<4x8x8xbf16, #tpu.memory_space<vmem>>, vector<1x8x8xbf16>
      %237 = vector.shape_cast %236 : vector<1x8x8xbf16> to vector<8x8xbf16>
      %238 = vector.shape_cast %235 : vector<8x8xbf16> to vector<1x8x8xbf16>
      tpu.vector_store %arg22[%c2_128, %c0_129, %c0_130], %238 {strides = array<i32>} : memref<4x8x8xbf16, #tpu.memory_space<vmem>>, vector<1x8x8xbf16>,
      %239 = vector.extract_strided_slice %213 {offsets = [24, 0], sizes = [8, 8], strides = [1, 1]} : vector<32x8xbf16> to vector<8x8xbf16>
      %c3_131 = arith.constant 3 : index
      %c0_132 = arith.constant 0 : index
      %c0_133 = arith.constant 0 : index
      %240 = vector.load %arg21[%c3_131, %c0_132, %c0_133] : memref<4x8x8xbf16, #tpu.memory_space<vmem>>, vector<1x8x8xbf16>
      %241 = vector.shape_cast %240 : vector<1x8x8xbf16> to vector<8x8xbf16>
      %242 = vector.shape_cast %239 : vector<8x8xbf16> to vector<1x8x8xbf16>
      tpu.vector_store %arg21[%c3_131, %c0_132, %c0_133], %242 {strides = array<i32>} : memref<4x8x8xbf16, #tpu.memory_space<vmem>>, vector<1x8x8xbf16>,
      %243 = vector.extract_strided_slice %214 {offsets = [0, 24], sizes = [8, 8], strides = [1, 1]} : vector<8x32xbf16> to vector<8x8xbf16>
      %c3_134 = arith.constant 3 : index
      %c0_135 = arith.constant 0 : index
      %c0_136 = arith.constant 0 : index
      %244 = vector.load %arg22[%c3_134, %c0_135, %c0_136] : memref<4x8x8xbf16, #tpu.memory_space<vmem>>, vector<1x8x8xbf16>
      %245 = vector.shape_cast %244 : vector<1x8x8xbf16> to vector<8x8xbf16>
      %246 = vector.shape_cast %243 : vector<8x8xbf16> to vector<1x8x8xbf16>
      tpu.vector_store %arg22[%c3_134, %c0_135, %c0_136], %246 {strides = array<i32>} : memref<4x8x8xbf16, #tpu.memory_space<vmem>>, vector<1x8x8xbf16>,
    } else {
    }
    %c8_i32 = arith.constant 8 : i32
    %3 = arith.muli %arg1, %c8_i32 : i32
    %4 = tpu.assume_multiple %3, 8 : i32
    %c0 = arith.constant 0 : index
    %5 = arith.index_cast %4 : i32 to index
    %c0_1 = arith.constant 0 : index
    %6 = vector.load %arg2[%c0, %5, %c0_1] : memref<1x8x32xf32, #tpu.memory_space<vmem>>, vector<1x8x32xf32>
    %7 = vector.shape_cast %6 : vector<1x8x32xf32> to vector<8x32xf32>
    %c0_2 = arith.constant 0 : index
    %c0_3 = arith.constant 0 : index
    %8 = vector.load %arg4[%c0_2, %c0_3] : memref<1x32xf32, #tpu.memory_space<vmem>>, vector<1x32xf32>
    %c0_4 = arith.constant 0 : index
    %c0_5 = arith.constant 0 : index
    %9 = vector.load %arg5[%c0_4, %c0_5] : memref<1x32xf32, #tpu.memory_space<vmem>>, vector<1x32xf32>
    %cst = arith.constant dense<0.000000e+00> : vector<8xf32>
    %10 = vector.multi_reduction <add>, %7, %cst [1] : vector<8x32xf32> to vector<8xf32>
    %11 = vector.shape_cast %10 : vector<8xf32> to vector<8x1xf32>
    %cst_6 = arith.constant 3.200000e+01 : f32
    %12 = vector.broadcast %cst_6 : f32 to vector<8x1xf32>
    %13 = arith.divf %11, %12 : vector<8x1xf32>
    %14 = vector.broadcast %13 : vector<8x1xf32> to vector<8x32xf32>
    %15 = arith.subf %7, %14 : vector<8x32xf32>
    %16 = arith.mulf %15, %15 : vector<8x32xf32>
    %cst_7 = arith.constant dense<0.000000e+00> : vector<8xf32>
    %17 = vector.multi_reduction <add>, %16, %cst_7 [1] : vector<8x32xf32> to vector<8xf32>
    %18 = vector.shape_cast %17 : vector<8xf32> to vector<8x1xf32>
    %cst_8 = arith.constant 3.200000e+01 : f32
    %19 = vector.broadcast %cst_8 : f32 to vector<8x1xf32>
    %20 = arith.divf %18, %19 : vector<8x1xf32>
    %cst_9 = arith.constant 9.99999997E-7 : f32
    %21 = vector.broadcast %cst_9 : f32 to vector<8x1xf32>
    %22 = arith.addf %20, %21 : vector<8x1xf32>
    %23 = math.rsqrt %22 : vector<8x1xf32>
    %24 = vector.broadcast %13 : vector<8x1xf32> to vector<8x32xf32>
    %25 = arith.subf %7, %24 : vector<8x32xf32>
    %26 = vector.broadcast %23 : vector<8x1xf32> to vector<8x32xf32>
    %27 = arith.mulf %25, %26 : vector<8x32xf32>
    %28 = vector.broadcast %8 : vector<1x32xf32> to vector<8x32xf32>
    %29 = arith.mulf %27, %28 : vector<8x32xf32>
    %30 = vector.broadcast %9 : vector<1x32xf32> to vector<8x32xf32>
    %31 = arith.addf %29, %30 : vector<8x32xf32>
    %32 = arith.truncf %31 : vector<8x32xf32> to vector<8x32xbf16>
    %c0_10 = arith.constant 0 : index
    %c0_11 = arith.constant 0 : index
    %33 = vector.load %arg6[%c0_10, %c0_11] : memref<32x32xbf16, #tpu.memory_space<vmem>>, vector<32x32xbf16>
    %cst_12 = arith.constant dense<0.000000e+00> : vector<8x32xf32>
    %34 = tpu.matmul %32, %33, %cst_12 {dimension_numbers = #tpu.dot_dimension_numbers<[1], [0], [0], [1], [0, 0, 1, 1], [], []>} : vector<8x32xbf16>, vector<32x32xbf16>, vector<8x32xf32> -> vector<8x32xf32>
    %c0_13 = arith.constant 0 : index
    %c0_14 = arith.constant 0 : index
    %35 = vector.load %arg7[%c0_13, %c0_14] : memref<1x32xf32, #tpu.memory_space<vmem>>, vector<1x32xf32>
    %36 = vector.broadcast %35 : vector<1x32xf32> to vector<8x32xf32>
    %37 = arith.addf %34, %36 : vector<8x32xf32>
    %cst_15 = arith.constant 0.353553385 : f32
    %38 = vector.broadcast %cst_15 : f32 to vector<8x32xf32>
    %39 = arith.mulf %37, %38 : vector<8x32xf32>
    %40 = arith.truncf %39 : vector<8x32xf32> to vector<8x32xbf16>
    %c0_16 = arith.constant 0 : index
    %c0_17 = arith.constant 0 : index
    %c0_18 = arith.constant 0 : index
    %41 = vector.load %arg3[%c0_16, %c0_17, %c0_18] : memref<1x1x8xf32, #tpu.memory_space<vmem>>, vector<1x1x8xf32>
    %42 = vector.shape_cast %41 : vector<1x1x8xf32> to vector<1x8xf32>
    %43 = vector.shape_cast %42 : vector<1x8xf32> to vector<1x8xf32>
    %44 = vector.broadcast %43 : vector<1x8xf32> to vector<8x8xf32>
    %45 = vector.extract_strided_slice %40 {offsets = [0, 0], sizes = [8, 8], strides = [1, 1]} : vector<8x32xbf16> to vector<8x8xbf16>
    %c0_19 = arith.constant 0 : index
    %c0_20 = arith.constant 0 : index
    %c0_21 = arith.constant 0 : index
    %46 = vector.load %arg21[%c0_19, %c0_20, %c0_21] : memref<4x8x8xbf16, #tpu.memory_space<vmem>>, vector<1x8x8xbf16>
    %47 = vector.shape_cast %46 : vector<1x8x8xbf16> to vector<8x8xbf16>
    %cst_22 = arith.constant dense<0.000000e+00> : vector<8x8xf32>
    %48 = tpu.matmul %45, %47, %cst_22 {dimension_numbers = #tpu.dot_dimension_numbers<[1], [0], [0], [1], [0, 0, 1, 1], [], []>} : vector<8x8xbf16>, vector<8x8xbf16>, vector<8x8xf32> -> vector<8x8xf32>
    %49 = arith.addf %48, %44 : vector<8x8xf32>
    %cst_23 = arith.constant dense<0xFF800000> : vector<8xf32>
    %50 = vector.multi_reduction <maximumf>, %49, %cst_23 [1] : vector<8x8xf32> to vector<8xf32>
    %51 = vector.shape_cast %50 : vector<8xf32> to vector<8x1xf32>
    %52 = vector.broadcast %51 : vector<8x1xf32> to vector<8x8xf32>
    %53 = arith.subf %49, %52 : vector<8x8xf32>
    %54 = math.exp %53 : vector<8x8xf32>
    %cst_24 = arith.constant dense<0.000000e+00> : vector<8xf32>
    %55 = vector.multi_reduction <add>, %54, %cst_24 [1] : vector<8x8xf32> to vector<8xf32>
    %56 = vector.shape_cast %55 : vector<8xf32> to vector<8x1xf32>
    %57 = arith.truncf %54 : vector<8x8xf32> to vector<8x8xbf16>
    %c0_25 = arith.constant 0 : index
    %c0_26 = arith.constant 0 : index
    %c0_27 = arith.constant 0 : index
    %58 = vector.load %arg22[%c0_25, %c0_26, %c0_27] : memref<4x8x8xbf16, #tpu.memory_space<vmem>>, vector<1x8x8xbf16>
    %59 = vector.shape_cast %58 : vector<1x8x8xbf16> to vector<8x8xbf16>
    %cst_28 = arith.constant dense<0.000000e+00> : vector<8x8xf32>
    %60 = tpu.matmul %57, %59, %cst_28 {dimension_numbers = #tpu.dot_dimension_numbers<[1], [0], [0], [1], [0, 0, 1, 1], [], []>} : vector<8x8xbf16>, vector<8x8xbf16>, vector<8x8xf32> -> vector<8x8xf32>
    %61 = tpu.reciprocal %56 {approx = true} : vector<8x1xf32> -> vector<8x1xf32>
    %62 = vector.broadcast %61 : vector<8x1xf32> to vector<8x8xf32>
    %63 = arith.mulf %60, %62 : vector<8x8xf32>
    %c0_29 = arith.constant 0 : index
    %c0_30 = arith.constant 0 : index
    %64 = vector.load %arg23[%c0_29, %c0_30] : memref<8x32xf32, #tpu.memory_space<vmem>>, vector<8x8xf32>
    tpu.vector_store %arg23[%c0_29, %c0_30], %63 {strides = array<i32>} : memref<8x32xf32, #tpu.memory_space<vmem>>, vector<8x8xf32>,
    %65 = vector.extract_strided_slice %40 {offsets = [0, 8], sizes = [8, 8], strides = [1, 1]} : vector<8x32xbf16> to vector<8x8xbf16>
    %c1 = arith.constant 1 : index
    %c0_31 = arith.constant 0 : index
    %c0_32 = arith.constant 0 : index
    %66 = vector.load %arg21[%c1, %c0_31, %c0_32] : memref<4x8x8xbf16, #tpu.memory_space<vmem>>, vector<1x8x8xbf16>
    %67 = vector.shape_cast %66 : vector<1x8x8xbf16> to vector<8x8xbf16>
    %cst_33 = arith.constant dense<0.000000e+00> : vector<8x8xf32>
    %68 = tpu.matmul %65, %67, %cst_33 {dimension_numbers = #tpu.dot_dimension_numbers<[1], [0], [0], [1], [0, 0, 1, 1], [], []>} : vector<8x8xbf16>, vector<8x8xbf16>, vector<8x8xf32> -> vector<8x8xf32>
    %69 = arith.addf %68, %44 : vector<8x8xf32>
    %cst_34 = arith.constant dense<0xFF800000> : vector<8xf32>
    %70 = vector.multi_reduction <maximumf>, %69, %cst_34 [1] : vector<8x8xf32> to vector<8xf32>
    %71 = vector.shape_cast %70 : vector<8xf32> to vector<8x1xf32>
    %72 = vector.broadcast %71 : vector<8x1xf32> to vector<8x8xf32>
    %73 = arith.subf %69, %72 : vector<8x8xf32>
    %74 = math.exp %73 : vector<8x8xf32>
    %cst_35 = arith.constant dense<0.000000e+00> : vector<8xf32>
    %75 = vector.multi_reduction <add>, %74, %cst_35 [1] : vector<8x8xf32> to vector<8xf32>
    %76 = vector.shape_cast %75 : vector<8xf32> to vector<8x1xf32>
    %77 = arith.truncf %74 : vector<8x8xf32> to vector<8x8xbf16>
    %c1_36 = arith.constant 1 : index
    %c0_37 = arith.constant 0 : index
    %c0_38 = arith.constant 0 : index
    %78 = vector.load %arg22[%c1_36, %c0_37, %c0_38] : memref<4x8x8xbf16, #tpu.memory_space<vmem>>, vector<1x8x8xbf16>
    %79 = vector.shape_cast %78 : vector<1x8x8xbf16> to vector<8x8xbf16>
    %cst_39 = arith.constant dense<0.000000e+00> : vector<8x8xf32>
    %80 = tpu.matmul %77, %79, %cst_39 {dimension_numbers = #tpu.dot_dimension_numbers<[1], [0], [0], [1], [0, 0, 1, 1], [], []>} : vector<8x8xbf16>, vector<8x8xbf16>, vector<8x8xf32> -> vector<8x8xf32>
    %81 = tpu.reciprocal %76 {approx = true} : vector<8x1xf32> -> vector<8x1xf32>
    %82 = vector.broadcast %81 : vector<8x1xf32> to vector<8x8xf32>
    %83 = arith.mulf %80, %82 : vector<8x8xf32>
    %c0_40 = arith.constant 0 : index
    %c8 = arith.constant 8 : index
    %84 = vector.load %arg23[%c0_40, %c8] : memref<8x32xf32, #tpu.memory_space<vmem>>, vector<8x8xf32>
    tpu.vector_store %arg23[%c0_40, %c8], %83 {strides = array<i32>} : memref<8x32xf32, #tpu.memory_space<vmem>>, vector<8x8xf32>,
    %85 = vector.extract_strided_slice %40 {offsets = [0, 16], sizes = [8, 8], strides = [1, 1]} : vector<8x32xbf16> to vector<8x8xbf16>
    %c2 = arith.constant 2 : index
    %c0_41 = arith.constant 0 : index
    %c0_42 = arith.constant 0 : index
    %86 = vector.load %arg21[%c2, %c0_41, %c0_42] : memref<4x8x8xbf16, #tpu.memory_space<vmem>>, vector<1x8x8xbf16>
    %87 = vector.shape_cast %86 : vector<1x8x8xbf16> to vector<8x8xbf16>
    %cst_43 = arith.constant dense<0.000000e+00> : vector<8x8xf32>
    %88 = tpu.matmul %85, %87, %cst_43 {dimension_numbers = #tpu.dot_dimension_numbers<[1], [0], [0], [1], [0, 0, 1, 1], [], []>} : vector<8x8xbf16>, vector<8x8xbf16>, vector<8x8xf32> -> vector<8x8xf32>
    %89 = arith.addf %88, %44 : vector<8x8xf32>
    %cst_44 = arith.constant dense<0xFF800000> : vector<8xf32>
    %90 = vector.multi_reduction <maximumf>, %89, %cst_44 [1] : vector<8x8xf32> to vector<8xf32>
    %91 = vector.shape_cast %90 : vector<8xf32> to vector<8x1xf32>
    %92 = vector.broadcast %91 : vector<8x1xf32> to vector<8x8xf32>
    %93 = arith.subf %89, %92 : vector<8x8xf32>
    %94 = math.exp %93 : vector<8x8xf32>
    %cst_45 = arith.constant dense<0.000000e+00> : vector<8xf32>
    %95 = vector.multi_reduction <add>, %94, %cst_45 [1] : vector<8x8xf32> to vector<8xf32>
    %96 = vector.shape_cast %95 : vector<8xf32> to vector<8x1xf32>
    %97 = arith.truncf %94 : vector<8x8xf32> to vector<8x8xbf16>
    %c2_46 = arith.constant 2 : index
    %c0_47 = arith.constant 0 : index
    %c0_48 = arith.constant 0 : index
    %98 = vector.load %arg22[%c2_46, %c0_47, %c0_48] : memref<4x8x8xbf16, #tpu.memory_space<vmem>>, vector<1x8x8xbf16>
    %99 = vector.shape_cast %98 : vector<1x8x8xbf16> to vector<8x8xbf16>
    %cst_49 = arith.constant dense<0.000000e+00> : vector<8x8xf32>
    %100 = tpu.matmul %97, %99, %cst_49 {dimension_numbers = #tpu.dot_dimension_numbers<[1], [0], [0], [1], [0, 0, 1, 1], [], []>} : vector<8x8xbf16>, vector<8x8xbf16>, vector<8x8xf32> -> vector<8x8xf32>
    %101 = tpu.reciprocal %96 {approx = true} : vector<8x1xf32> -> vector<8x1xf32>
    %102 = vector.broadcast %101 : vector<8x1xf32> to vector<8x8xf32>
    %103 = arith.mulf %100, %102 : vector<8x8xf32>
    %c0_50 = arith.constant 0 : index
    %c16 = arith.constant 16 : index
    %104 = vector.load %arg23[%c0_50, %c16] : memref<8x32xf32, #tpu.memory_space<vmem>>, vector<8x8xf32>
    tpu.vector_store %arg23[%c0_50, %c16], %103 {strides = array<i32>} : memref<8x32xf32, #tpu.memory_space<vmem>>, vector<8x8xf32>,
    %105 = vector.extract_strided_slice %40 {offsets = [0, 24], sizes = [8, 8], strides = [1, 1]} : vector<8x32xbf16> to vector<8x8xbf16>
    %c3 = arith.constant 3 : index
    %c0_51 = arith.constant 0 : index
    %c0_52 = arith.constant 0 : index
    %106 = vector.load %arg21[%c3, %c0_51, %c0_52] : memref<4x8x8xbf16, #tpu.memory_space<vmem>>, vector<1x8x8xbf16>
    %107 = vector.shape_cast %106 : vector<1x8x8xbf16> to vector<8x8xbf16>
    %cst_53 = arith.constant dense<0.000000e+00> : vector<8x8xf32>
    %108 = tpu.matmul %105, %107, %cst_53 {dimension_numbers = #tpu.dot_dimension_numbers<[1], [0], [0], [1], [0, 0, 1, 1], [], []>} : vector<8x8xbf16>, vector<8x8xbf16>, vector<8x8xf32> -> vector<8x8xf32>
    %109 = arith.addf %108, %44 : vector<8x8xf32>
    %cst_54 = arith.constant dense<0xFF800000> : vector<8xf32>
    %110 = vector.multi_reduction <maximumf>, %109, %cst_54 [1] : vector<8x8xf32> to vector<8xf32>
    %111 = vector.shape_cast %110 : vector<8xf32> to vector<8x1xf32>
    %112 = vector.broadcast %111 : vector<8x1xf32> to vector<8x8xf32>
    %113 = arith.subf %109, %112 : vector<8x8xf32>
    %114 = math.exp %113 : vector<8x8xf32>
    %cst_55 = arith.constant dense<0.000000e+00> : vector<8xf32>
    %115 = vector.multi_reduction <add>, %114, %cst_55 [1] : vector<8x8xf32> to vector<8xf32>
    %116 = vector.shape_cast %115 : vector<8xf32> to vector<8x1xf32>
    %117 = arith.truncf %114 : vector<8x8xf32> to vector<8x8xbf16>
    %c3_56 = arith.constant 3 : index
    %c0_57 = arith.constant 0 : index
    %c0_58 = arith.constant 0 : index
    %118 = vector.load %arg22[%c3_56, %c0_57, %c0_58] : memref<4x8x8xbf16, #tpu.memory_space<vmem>>, vector<1x8x8xbf16>
    %119 = vector.shape_cast %118 : vector<1x8x8xbf16> to vector<8x8xbf16>
    %cst_59 = arith.constant dense<0.000000e+00> : vector<8x8xf32>
    %120 = tpu.matmul %117, %119, %cst_59 {dimension_numbers = #tpu.dot_dimension_numbers<[1], [0], [0], [1], [0, 0, 1, 1], [], []>} : vector<8x8xbf16>, vector<8x8xbf16>, vector<8x8xf32> -> vector<8x8xf32>
    %121 = tpu.reciprocal %116 {approx = true} : vector<8x1xf32> -> vector<8x1xf32>
    %122 = vector.broadcast %121 : vector<8x1xf32> to vector<8x8xf32>
    %123 = arith.mulf %120, %122 : vector<8x8xf32>
    %c0_60 = arith.constant 0 : index
    %c24 = arith.constant 24 : index
    %124 = vector.load %arg23[%c0_60, %c24] : memref<8x32xf32, #tpu.memory_space<vmem>>, vector<8x8xf32>
    tpu.vector_store %arg23[%c0_60, %c24], %123 {strides = array<i32>} : memref<8x32xf32, #tpu.memory_space<vmem>>, vector<8x8xf32>,
    %c0_61 = arith.constant 0 : index
    %c0_62 = arith.constant 0 : index
    %125 = vector.load %arg23[%c0_61, %c0_62] : memref<8x32xf32, #tpu.memory_space<vmem>>, vector<8x32xf32>
    %126 = arith.truncf %125 : vector<8x32xf32> to vector<8x32xbf16>
    %c0_63 = arith.constant 0 : index
    %c0_64 = arith.constant 0 : index
    %127 = vector.load %arg12[%c0_63, %c0_64] : memref<32x32xbf16, #tpu.memory_space<vmem>>, vector<32x32xbf16>
    %cst_65 = arith.constant dense<0.000000e+00> : vector<8x32xf32>
    %128 = tpu.matmul %126, %127, %cst_65 {dimension_numbers = #tpu.dot_dimension_numbers<[1], [0], [0], [1], [0, 0, 1, 1], [], []>} : vector<8x32xbf16>, vector<32x32xbf16>, vector<8x32xf32> -> vector<8x32xf32>
    %c0_66 = arith.constant 0 : index
    %c0_67 = arith.constant 0 : index
    %129 = vector.load %arg13[%c0_66, %c0_67] : memref<1x32xf32, #tpu.memory_space<vmem>>, vector<1x32xf32>
    %130 = vector.broadcast %129 : vector<1x32xf32> to vector<8x32xf32>
    %131 = arith.addf %128, %130 : vector<8x32xf32>
    %132 = arith.addf %7, %131 : vector<8x32xf32>
    %c0_68 = arith.constant 0 : index
    %c0_69 = arith.constant 0 : index
    %133 = vector.load %arg14[%c0_68, %c0_69] : memref<1x32xf32, #tpu.memory_space<vmem>>, vector<1x32xf32>
    %c0_70 = arith.constant 0 : index
    %c0_71 = arith.constant 0 : index
    %134 = vector.load %arg15[%c0_70, %c0_71] : memref<1x32xf32, #tpu.memory_space<vmem>>, vector<1x32xf32>
    %cst_72 = arith.constant dense<0.000000e+00> : vector<8xf32>
    %135 = vector.multi_reduction <add>, %132, %cst_72 [1] : vector<8x32xf32> to vector<8xf32>
    %136 = vector.shape_cast %135 : vector<8xf32> to vector<8x1xf32>
    %cst_73 = arith.constant 3.200000e+01 : f32
    %137 = vector.broadcast %cst_73 : f32 to vector<8x1xf32>
    %138 = arith.divf %136, %137 : vector<8x1xf32>
    %139 = vector.broadcast %138 : vector<8x1xf32> to vector<8x32xf32>
    %140 = arith.subf %132, %139 : vector<8x32xf32>
    %141 = arith.mulf %140, %140 : vector<8x32xf32>
    %cst_74 = arith.constant dense<0.000000e+00> : vector<8xf32>
    %142 = vector.multi_reduction <add>, %141, %cst_74 [1] : vector<8x32xf32> to vector<8xf32>
    %143 = vector.shape_cast %142 : vector<8xf32> to vector<8x1xf32>
    %cst_75 = arith.constant 3.200000e+01 : f32
    %144 = vector.broadcast %cst_75 : f32 to vector<8x1xf32>
    %145 = arith.divf %143, %144 : vector<8x1xf32>
    %cst_76 = arith.constant 9.99999997E-7 : f32
    %146 = vector.broadcast %cst_76 : f32 to vector<8x1xf32>
    %147 = arith.addf %145, %146 : vector<8x1xf32>
    %148 = math.rsqrt %147 : vector<8x1xf32>
    %149 = vector.broadcast %138 : vector<8x1xf32> to vector<8x32xf32>
    %150 = arith.subf %132, %149 : vector<8x32xf32>
    %151 = vector.broadcast %148 : vector<8x1xf32> to vector<8x32xf32>
    %152 = arith.mulf %150, %151 : vector<8x32xf32>
    %153 = vector.broadcast %133 : vector<1x32xf32> to vector<8x32xf32>
    %154 = arith.mulf %152, %153 : vector<8x32xf32>
    %155 = vector.broadcast %134 : vector<1x32xf32> to vector<8x32xf32>
    %156 = arith.addf %154, %155 : vector<8x32xf32>
    %157 = arith.truncf %156 : vector<8x32xf32> to vector<8x32xbf16>
    %c0_77 = arith.constant 0 : index
    %c0_78 = arith.constant 0 : index
    %158 = vector.load %arg16[%c0_77, %c0_78] : memref<32x64xbf16, #tpu.memory_space<vmem>>, vector<32x64xbf16>
    %cst_79 = arith.constant dense<0.000000e+00> : vector<8x64xf32>
    %159 = tpu.matmul %157, %158, %cst_79 {dimension_numbers = #tpu.dot_dimension_numbers<[1], [0], [0], [1], [0, 0, 1, 1], [], []>} : vector<8x32xbf16>, vector<32x64xbf16>, vector<8x64xf32> -> vector<8x64xf32>
    %c0_80 = arith.constant 0 : index
    %c0_81 = arith.constant 0 : index
    %160 = vector.load %arg17[%c0_80, %c0_81] : memref<1x64xf32, #tpu.memory_space<vmem>>, vector<1x64xf32>
    %161 = vector.broadcast %160 : vector<1x64xf32> to vector<8x64xf32>
    %162 = arith.addf %159, %161 : vector<8x64xf32>
    %cst_82 = arith.constant 0.000000e+00 : f32
    %163 = vector.broadcast %cst_82 : f32 to vector<8x64xf32>
    %164 = arith.maximumf %162, %163 : vector<8x64xf32>
    %165 = arith.truncf %164 : vector<8x64xf32> to vector<8x64xbf16>
    %c0_83 = arith.constant 0 : index
    %c0_84 = arith.constant 0 : index
    %166 = vector.load %arg18[%c0_83, %c0_84] : memref<64x32xbf16, #tpu.memory_space<vmem>>, vector<64x32xbf16>
    %cst_85 = arith.constant dense<0.000000e+00> : vector<8x32xf32>
    %167 = tpu.matmul %165, %166, %cst_85 {dimension_numbers = #tpu.dot_dimension_numbers<[1], [0], [0], [1], [0, 0, 1, 1], [], []>} : vector<8x64xbf16>, vector<64x32xbf16>, vector<8x32xf32> -> vector<8x32xf32>
    %c0_86 = arith.constant 0 : index
    %c0_87 = arith.constant 0 : index
    %168 = vector.load %arg19[%c0_86, %c0_87] : memref<1x32xf32, #tpu.memory_space<vmem>>, vector<1x32xf32>
    %169 = vector.broadcast %168 : vector<1x32xf32> to vector<8x32xf32>
    %170 = arith.addf %167, %169 : vector<8x32xf32>
    %171 = arith.addf %132, %170 : vector<8x32xf32>
    %c0_88 = arith.constant 0 : index
    %c0_89 = arith.constant 0 : index
    %c0_90 = arith.constant 0 : index
    %172 = vector.load %arg20[%c0_88, %c0_89, %c0_90] : memref<1x8x32xf32, #tpu.memory_space<vmem>>, vector<1x8x32xf32>
    %173 = vector.shape_cast %172 : vector<1x8x32xf32> to vector<8x32xf32>
    %174 = vector.shape_cast %171 : vector<8x32xf32> to vector<1x8x32xf32>
    tpu.vector_store %arg20[%c0_88, %c0_89, %c0_90], %174 {strides = array<i32>} : memref<1x8x32xf32, #tpu.memory_space<vmem>>, vector<1x8x32xf32>,
    return
  }
  func.func @transform_0(%arg0: i32, %arg1: i32) -> (i32, i32, i32) {
    %c0_i32 = arith.constant 0 : i32
    %c0_i32_0 = arith.constant 0 : i32
    %c0_i32_1 = arith.constant 0 : i32
    return %arg0, %c0_i32, %c0_i32_0 : i32, i32, i32
  }
  func.func @transform_1(%arg0: i32, %arg1: i32) -> (i32, i32, i32) {
    %c0_i32 = arith.constant 0 : i32
    %c0_i32_0 = arith.constant 0 : i32
    %c0_i32_1 = arith.constant 0 : i32
    return %arg0, %c0_i32, %c0_i32_0 : i32, i32, i32
  }
  func.func @transform_2(%arg0: i32, %arg1: i32) -> (i32, i32) {
    %c0_i32 = arith.constant 0 : i32
    %c0_i32_0 = arith.constant 0 : i32
    %c0_i32_1 = arith.constant 0 : i32
    return %c0_i32, %c0_i32_0 : i32, i32
  }
  func.func @transform_3(%arg0: i32, %arg1: i32) -> (i32, i32) {
    %c0_i32 = arith.constant 0 : i32
    %c0_i32_0 = arith.constant 0 : i32
    %c0_i32_1 = arith.constant 0 : i32
    return %c0_i32, %c0_i32_0 : i32, i32
  }
  func.func @transform_4(%arg0: i32, %arg1: i32) -> (i32, i32) {
    %c0_i32 = arith.constant 0 : i32
    %c0_i32_0 = arith.constant 0 : i32
    %c0_i32_1 = arith.constant 0 : i32
    return %c0_i32, %c0_i32_0 : i32, i32
  }
  func.func @transform_5(%arg0: i32, %arg1: i32) -> (i32, i32) {
    %c0_i32 = arith.constant 0 : i32
    %c0_i32_0 = arith.constant 0 : i32
    %c0_i32_1 = arith.constant 0 : i32
    return %c0_i32, %c0_i32_0 : i32, i32
  }
  func.func @transform_6(%arg0: i32, %arg1: i32) -> (i32, i32) {
    %c0_i32 = arith.constant 0 : i32
    %c0_i32_0 = arith.constant 0 : i32
    %c0_i32_1 = arith.constant 0 : i32
    return %c0_i32, %c0_i32_0 : i32, i32
  }
  func.func @transform_7(%arg0: i32, %arg1: i32) -> (i32, i32) {
    %c0_i32 = arith.constant 0 : i32
    %c0_i32_0 = arith.constant 0 : i32
    %c0_i32_1 = arith.constant 0 : i32
    return %c0_i32, %c0_i32_0 : i32, i32
  }
  func.func @transform_8(%arg0: i32, %arg1: i32) -> (i32, i32) {
    %c0_i32 = arith.constant 0 : i32
    %c0_i32_0 = arith.constant 0 : i32
    %c0_i32_1 = arith.constant 0 : i32
    return %c0_i32, %c0_i32_0 : i32, i32
  }
  func.func @transform_9(%arg0: i32, %arg1: i32) -> (i32, i32) {
    %c0_i32 = arith.constant 0 : i32
    %c0_i32_0 = arith.constant 0 : i32
    %c0_i32_1 = arith.constant 0 : i32
    return %c0_i32, %c0_i32_0 : i32, i32
  }
  func.func @transform_10(%arg0: i32, %arg1: i32) -> (i32, i32) {
    %c0_i32 = arith.constant 0 : i32
    %c0_i32_0 = arith.constant 0 : i32
    %c0_i32_1 = arith.constant 0 : i32
    return %c0_i32, %c0_i32_0 : i32, i32
  }
  func.func @transform_11(%arg0: i32, %arg1: i32) -> (i32, i32) {
    %c0_i32 = arith.constant 0 : i32
    %c0_i32_0 = arith.constant 0 : i32
    %c0_i32_1 = arith.constant 0 : i32
    return %c0_i32, %c0_i32_0 : i32, i32
  }
  func.func @transform_12(%arg0: i32, %arg1: i32) -> (i32, i32) {
    %c0_i32 = arith.constant 0 : i32
    %c0_i32_0 = arith.constant 0 : i32
    %c0_i32_1 = arith.constant 0 : i32
    return %c0_i32, %c0_i32_0 : i32, i32
  }
  func.func @transform_13(%arg0: i32, %arg1: i32) -> (i32, i32) {
    %c0_i32 = arith.constant 0 : i32
    %c0_i32_0 = arith.constant 0 : i32
    %c0_i32_1 = arith.constant 0 : i32
    return %c0_i32, %c0_i32_0 : i32, i32
  }
  func.func @transform_14(%arg0: i32, %arg1: i32) -> (i32, i32) {
    %c0_i32 = arith.constant 0 : i32
    %c0_i32_0 = arith.constant 0 : i32
    %c0_i32_1 = arith.constant 0 : i32
    return %c0_i32, %c0_i32_0 : i32, i32
  }
  func.func @transform_15(%arg0: i32, %arg1: i32) -> (i32, i32) {
    %c0_i32 = arith.constant 0 : i32
    %c0_i32_0 = arith.constant 0 : i32
    %c0_i32_1 = arith.constant 0 : i32
    return %c0_i32, %c0_i32_0 : i32, i32
  }
  func.func @transform_16(%arg0: i32, %arg1: i32) -> (i32, i32) {
    %c0_i32 = arith.constant 0 : i32
    %c0_i32_0 = arith.constant 0 : i32
    %c0_i32_1 = arith.constant 0 : i32
    return %c0_i32, %c0_i32_0 : i32, i32
  }
  func.func @transform_17(%arg0: i32, %arg1: i32) -> (i32, i32) {
    %c0_i32 = arith.constant 0 : i32
    %c0_i32_0 = arith.constant 0 : i32
    %c0_i32_1 = arith.constant 0 : i32
    return %c0_i32, %c0_i32_0 : i32, i32
  }
  func.func @transform_18(%arg0: i32, %arg1: i32) -> (i32, i32, i32) {
    %c0_i32 = arith.constant 0 : i32
    %c0_i32_0 = arith.constant 0 : i32
    return %arg0, %arg1, %c0_i32 : i32, i32, i32
  }
}

</mosaic_0001>

<bundles_post_ra>
// kernel: tpu_custom_call.1
= control target key start
LH: loop header
LB: loop body
LE: loop exit
PB: predicated region body
PF: predicated region fallthrough
CT: control target
= control target key end

     0   :  { %6 = vsyncpa [#allocation3], 0  ;;  %s102_s0 = inlined_call_operand.hbm [shape: f32[8,128], index: 0, kind: input, shape index: {}]   ;;  %s103_s1 = inlined_call_operand.hbm [shape: f32[8,128], index: 1, kind: output, shape index: {}]  }
   0x1   :  { %7 = vsyncpa [#allocation4], 0  ;;  %s84_s6 = smov [#allocation2]  }
   0x2   :  { %s14_s7 = sshll.u32 %s84_s6, 4  ;;  %s15_s7 = int_to_ptr.vmem [resolvable:$true] %s14_s7 }
   0x3   :  { %s48_s8 = scalar_lea.vmem %s15_s7, 128  ;;  %p53_p1 = scmp.lt.s32.totalorder %s15_s7, %s15_s7 }
   0x4   :  { %p49_p0 = scmp.ne.s32.totalorder %s15_s7, %s48_s8  ;;  %p54_p2 = scmp.lt.s32.totalorder %s48_s8, %s48_s8 }
   0x6   :  { %p55_p3 = por %p54_p2, %p53_p1 }
   0x8   :  { %p56_p4 = pnand %p55_p3, %p49_p0 }
   0xa   :  { %59 = shalt.err (!%p56_p4)
}
   0xb   :  { %17 = dma.hbm_to_vmem [thread:$0]  %s102_s0, 128, %s15_s7, [#allocation3]  }
   0xc   :  { %80 = dma.done.wait [#allocation3], 128  }
   0xd   :  { %81 = vsyncadd [#allocation3], 4294967168  ;;  %s85_s11 = smov [#allocation5]   ;;  %v21_v0 = vld [vmem:[#allocation2] sm:$0xff] }
   0xe   :  { %s29_s12 = sshll.u32 %s85_s11, 4  ;;  %22 = vst [vmem:[#allocation5] sm:$0xff] %v21_v0  ;;  %s30_s12 = int_to_ptr.vmem [resolvable:$true] %s29_s12 }
   0xf   :  { %s60_s13 = scalar_lea.vmem %s30_s12, 128  ;;  %p65_p6 = scmp.lt.s32.totalorder %s30_s12, %s30_s12 }
  0x10   :  { %p61_p5 = scmp.ne.s32.totalorder %s30_s12, %s60_s13  ;;  %p66_p7 = scmp.lt.s32.totalorder %s60_s13, %s60_s13 }
  0x12   :  { %p67_p8 = por %p66_p7, %p65_p6 }
  0x14   :  { %p68_p9 = pnand %p67_p8, %p61_p5 }
  0x16   :  { %71 = shalt.err (!%p68_p9)
}
  0x17   :  { %32 = dma.vmem_to_hbm [thread:$0]  %s30_s12, 128, %s103_s1, [#allocation4]  }
  0x18   :  { %82 = dma.done.wait [#allocation4], 128  }
  0x19   :  { %83 = vsyncadd [#allocation4], 4294967168 }
  0x1a   :  { %36 = vsyncpa [#allocation3], 1 }
  0x1b   :  { %37 = vsyncpa [#allocation4], 1 }

// kernel: tpu_custom_call.1
= control target key start
LH: loop header
LB: loop body
LE: loop exit
PB: predicated region body
PF: predicated region fallthrough
CT: control target
= control target key end

     0   :  { %s3147_s0 = inlined_call_operand.vmem [shape: f32[2,8,32], index: 0, kind: input, shape index: {}]   ;;  %s3148_s1 = inlined_call_operand.hbm [shape: f32[2,1,8], index: 1, kind: input, shape index: {}]   ;;  %s3149_s2 = inlined_call_operand.hbm [shape: f32[1,32], index: 2, kind: input, shape index: {}]   ;;  %s3150_s3 = inlined_call_operand.hbm [shape: f32[1,32], index: 3, kind: input, shape index: {}]   ;;  %s3151_s4 = inlined_call_operand.vmem [shape: bf16[32,32], index: 4, kind: input, shape index: {}]   ;;  %s3152_s5 = inlined_call_operand.hbm [shape: f32[1,32], index: 5, kind: input, shape index: {}]   ;;  %s3153_s6 = inlined_call_operand.vmem [shape: bf16[32,32], index: 6, kind: input, shape index: {}]   ;;  %s3154_s7 = inlined_call_operand.hbm [shape: f32[1,32], index: 7, kind: input, shape index: {}]   ;;  %s3155_s8 = inlined_call_operand.hbm [shape: bf16[32,32], index: 8, kind: input, shape index: {}]   ;;  %s3156_s9 = inlined_call_operand.hbm [shape: f32[1,32], index: 9, kind: input, shape index: {}]   ;;  %s3157_s10 = inlined_call_operand.vmem [shape: bf16[32,32], index: 10, kind: input, shape index: {}]   ;;  %s3158_s11 = inlined_call_operand.vmem [shape: f32[1,32], index: 11, kind: input, shape index: {}]   ;;  %s3159_s12 = inlined_call_operand.vmem [shape: f32[1,32], index: 12, kind: input, shape index: {}]   ;;  %s3160_s13 = inlined_call_operand.vmem [shape: f32[1,32], index: 13, kind: input, shape index: {}]   ;;  %s3161_s14 = inlined_call_operand.hbm [shape: bf16[32,64], index: 14, kind: input, shape index: {}]   ;;  %s3162_s15 = inlined_call_operand.vmem [shape: f32[1,64], index: 15, kind: input, shape index: {}]   ;;  %s3163_s16 = inlined_call_operand.vmem [shape: bf16[64,32], index: 16, kind: input, shape index: {}]   ;;  %s3164_s17 = inlined_call_operand.vmem [shape: f32[1,32], index: 17, kind: input, shape index: {}]   ;;  %s3165_s18 = inlined_call_operand.hbm [shape: f32[2,8,32], index: 18, kind: output, shape index: {}]  }
   0x1   :  { %3173 = sst [smem:[#allocation27_spill]] %s3147_s0 }
   0x2   :  { %3174 = sst [smem:[#allocation28_spill]] %s3148_s1 }
   0x3   :  { %3175 = sst [smem:[#allocation29_spill]] %s3149_s2 }
   0x4   :  { %3176 = sst [smem:[#allocation30_spill]] %s3150_s3 }
   0x5   :  { %3177 = sst [smem:[#allocation31_spill]] %s3152_s5 }
   0x6   :  { %3178 = sst [smem:[#allocation32_spill]] %s3154_s7 }
   0x7   :  { %3179 = sst [smem:[#allocation33_spill]] %s3155_s8 }
   0x8   :  { %3180 = sst [smem:[#allocation34_spill]] %s3156_s9 }
   0x9   :  { %3181 = sst [smem:[#allocation35_spill]] %s3159_s12 }
   0xa   :  { %3182 = sst [smem:[#allocation36_spill]] %s3160_s13 }
   0xb   :  { %3183 = sst [smem:[#allocation37_spill]] %s3161_s14 }
   0xc   :  { %3184 = sst [smem:[#allocation38_spill]] %s3162_s15 }
   0xd   :  { %3185 = sst [smem:[#allocation39_spill]] %s3164_s17 }
   0xe   :  { %3186 = sst [smem:[#allocation40_spill]] %s3165_s18 }
   0xf   :  { %23 = vsyncpa [#allocation6], 0 }
  0x10   :  { %25 = vsyncpa [#allocation6 + $0x1], 0 }
  0x11   :  { %26 = vsyncpa [#allocation9], 0 }
  0x12   :  { %27 = vsyncpa [#allocation12], 0 }
  0x13   :  { %28 = vsyncpa [#allocation15], 0 }
  0x14   :  { %29 = vsyncpa [#allocation18], 0 }
  0x15   :  { %30 = vsyncpa [#allocation7], 0 }
  0x16   :  { %32 = vsyncpa [#allocation7 + $0x1], 0  ;;  %s2732_s27 = smov 0   ;;  %s2734_s28 = smov 0  }
  0x17   :  { %s2736_s29 = smov 0   ;;  %s2738_s30 = smov 0  }
  0x18   :  { %s2740_s0 = smov 0   ;;  %s2742_s19 = smov 0  }
  0x19 LB: > { %s3166_s1 = sadd.s32 4294967295, %s2616_s19   ;;  %p1925_p0 = scmp.ge.s32.totalorder %s2616_s19, 1  ;;  %s2616_s19 = sphi %s2742_s19, %s38_s19   ;;  %s2612_s0 = sphi %s2740_s0, %s3222_s0   ;;  %s2608_s30 = sphi %s2738_s30, %s3221_s30   ;;  %s2604_s29 = sphi %s2736_s29, %s3220_s29   ;;  %s2600_s28 = sphi %s2734_s28, %s3219_s28   ;;  %s2596_s27 = sphi %s2732_s27, %s3218_s27  }
  0x1a   : > { %p2766_p1 = scmp.eq.s32.totalorder %s3166_s1, 0  ;;  %p471_p2 = scmp.lt.s32.totalorder %s2616_s19, 3 }
  0x1b   : > { %s2618_s22 = smov [#allocation8]   ;;  %s2619_s23 = smov [#allocation11]  }
  0x1c   : > { %s3187_s20 = scalar_select %p2766_p1, 1, 0 }
  0x1d   : > { %p2771_p3 = pnand %p1925_p0, %p471_p2  ;;  %s484_s2 = sshll.u32 %s2618_s22, 4  ;;  %s485_s2 = int_to_ptr.vmem [resolvable:$true] %s484_s2 }
  0x1e   : > { %s509_s24 = sshll.u32 %s2619_s23, 4  ;;  %s2620_s26 = smov [#allocation14]   ;;  %s510_s24 = int_to_ptr.vmem [resolvable:$true] %s509_s24 }
  0x1f   : > { %s3188_s21 = scalar_select %p2771_p3, 1, 0 }
  0x20   : > { %p2162_p5 = pneg %p2771_p3  ;;  %s533_s1 = sshll.u32 %s2620_s26, 4  ;;  %s2784_s1 = int_to_ptr.vmem [resolvable:$true] %s533_s1 }
  0x21   : > { %s2321_s18 = scalar_lea.vmem %s485_s2, 16  ;;  %s2328_s23 = scalar_lea.vmem %s485_s2, 32 }
  0x22   : > { %p2780_p6 = pnand %p2162_p5, %p2766_p1  ;;  %p2322_p8 = scmp.ne.s32.totalorder %s485_s2, %s2321_s18 }
  0x23   : > { %p2329_p11 = scmp.lt.s32.totalorder %s485_s2, %s485_s2  ;;  %p2330_p12 = scmp.lt.s32.totalorder %s2328_s23, %s2321_s18 }
  0x24   : > { %p2788_p7 = pneg %p2780_p6 }
  0x25   : > { %p2331_p13 = por %p2330_p12, %p2329_p11 }
  0x26   : > { %p2324_p9 = pnand %p2322_p8, %p2788_p7 }
  0x28   : > { %p2325_p10 = pneg %p2324_p9 }
  0x2a   : > { %p2332_p0 = pnand %p2331_p13, %p2325_p10 }
  0x2c   : > { %2335 = shalt.err (!%p2332_p0)
}
  0x2d   : > { %s3191_s15 = sld [smem:[#allocation29_spill]]  ;;  %s2347_s13 = scalar_lea.vmem %s510_s24, 16 }
  0x2e   : > { %p2348_p2 = scmp.ne.s32.totalorder %s510_s24, %s2347_s13  ;;  %s2354_s12 = scalar_lea.vmem %s510_s24, 32 }
  0x2f   : > { %p2355_p8 = scmp.lt.s32.totalorder %s510_s24, %s510_s24  ;;  %p2356_p9 = scmp.lt.s32.totalorder %s2354_s12, %s2347_s13 }
  0x30   : > { %p2350_p5 = pnand %p2348_p2, %p2788_p7 }
  0x31   : > { %p2357_p3 = por %p2356_p9, %p2355_p8 }
  0x32   : > { %p2351_p4 = pneg %p2350_p5 }
  0x33   : > { %2165 = dma.hbm_to_vmem [thread:$0]  (!%p2780_p6), %s3191_s15, 16, %s485_s2, [#allocation9]  }
  0x34   : > { %p2358_p1 = pnand %p2357_p3, %p2351_p4 }
  0x36   : > { %2361 = shalt.err (!%p2358_p1)
}
  0x37   : > { %s3192_s5 = sld [smem:[#allocation31_spill]]  ;;  %s2373_s15 = scalar_lea.vmem %s2784_s1, 256 }
  0x38   : > { %p2374_p10 = scmp.ne.s32.totalorder %s2784_s1, %s2373_s15  ;;  %p2381_p13 = scmp.lt.s32.totalorder %s2784_s1, %s2784_s1 }
  0x39   : > { %p2382_p0 = scmp.lt.s32.totalorder %s2373_s15, %s2373_s15 }
  0x3a   : > { %p2376_p11 = pnand %p2374_p10, %p2788_p7 }
  0x3b   : > { %p2383_p3 = por %p2382_p0, %p2381_p13 }
  0x3c   : > { %p2377_p12 = pneg %p2376_p11 }
  0x3d   : > { %2171 = dma.hbm_to_vmem [thread:$0]  (!%p2780_p6), %s3192_s5, 16, %s510_s24, [#allocation12]  }
  0x3e   : > { %p2384_p1 = pnand %p2383_p3, %p2377_p12 }
  0x40   : > { %2387 = shalt.err (!%p2384_p1)
}
  0x41   : > { %s3171_s12 = smov 64   ;;  %s2622_s13 = smov 4  }
  0x42   : > { %s3193_s8 = sld [smem:[#allocation33_spill]]  ;;  %s2623_s24 = smov [#allocation10]  }
  0x43   : > { %s495_s26 = sshll.u32 %s2623_s24, 4  ;;  %s2624_s18 = smov [#allocation13]   ;;  %s496_s26 = int_to_ptr.vmem [resolvable:$true] %s495_s26 }
  0x44   : > { %s523_s23 = sshll.u32 %s2624_s18, 4  ;;  %s2399_s15 = scalar_lea.vmem %s496_s26, 16  ;;  %s524_s23 = int_to_ptr.vmem [resolvable:$true] %s523_s23 }
  0x45   : > { %p2400_p4 = scmp.ne.s32.totalorder %s496_s26, %s2399_s15  ;;  %s2406_s5 = scalar_lea.vmem %s496_s26, 32 }
  0x46   : > { %p2407_p8 = scmp.lt.s32.totalorder %s496_s26, %s496_s26  ;;  %p2408_p9 = scmp.lt.s32.totalorder %s2406_s5, %s2399_s15 }
  0x47   : > { %p2402_p2 = pnand %p2400_p4, %p2788_p7 }
  0x48   : > { %2177 = dma.hbm_to_vmem [thread:$0]  (!%p2780_p6), %s3193_s8, 256, %s2784_s1, [#allocation15], %s3171_s12, %s3171_s12, %s2622_s13  }
  0x49   : > { %p2403_p5 = pneg %p2402_p2  ;;  %p2409_p10 = por %p2408_p9, %p2407_p8 }
  0x4b   : > { %p2410_p11 = pnand %p2409_p10, %p2403_p5 }
  0x4d   : > { %2413 = shalt.err (!%p2410_p11)
}
  0x4e   : > { %s3194_s3 = sld [smem:[#allocation30_spill]]  ;;  %s2425_s2 = scalar_lea.vmem %s524_s23, 16 }
  0x4f   : > { %p2426_p12 = scmp.ne.s32.totalorder %s524_s23, %s2425_s2  ;;  %s2432_s24 = scalar_lea.vmem %s524_s23, 32 }
  0x50   : > { %p2433_p3 = scmp.lt.s32.totalorder %s524_s23, %s524_s23  ;;  %p2434_p1 = scmp.lt.s32.totalorder %s2432_s24, %s2425_s2 }
  0x51   : > { %p2428_p13 = pnand %p2426_p12, %p2788_p7 }
  0x52   : > { %p2435_p4 = por %p2434_p1, %p2433_p3 }
  0x53   : > { %p2429_p0 = pneg %p2428_p13 }
  0x54   : > { %2168 = dma.hbm_to_vmem [thread:$0]  (!%p2780_p6), %s3194_s3, 16, %s496_s26, [#allocation9]  }
  0x55   : > { %p2436_p2 = pnand %p2435_p4, %p2429_p0 }
  0x57   : > { %2439 = shalt.err (!%p2436_p2)
}
  0x58   : > { %s3195_s7 = sld [smem:[#allocation32_spill]]  ;;  %s2625_s26 = smov [#allocation16]  }
  0x59   : > { %s547_s15 = sshll.u32 %s2625_s26, 4  ;;  %s2626_s17 = smov [#allocation17]   ;;  %s548_s15 = int_to_ptr.vmem [resolvable:$true] %s547_s15 }
  0x5a   : > { %s569_s1 = sshll.u32 %s2626_s17, 4  ;;  %s2451_s12 = scalar_lea.vmem %s548_s15, 16  ;;  %s570_s1 = int_to_ptr.vmem [resolvable:$true] %s569_s1 }
  0x5b   : > { %p2452_p5 = scmp.ne.s32.totalorder %s548_s15, %s2451_s12  ;;  %s2458_s2 = scalar_lea.vmem %s548_s15, 32 }
  0x5c   : > { %p2459_p10 = scmp.lt.s32.totalorder %s548_s15, %s548_s15  ;;  %p2460_p11 = scmp.lt.s32.totalorder %s2458_s2, %s2451_s12 }
  0x5d   : > { %p2454_p8 = pnand %p2452_p5, %p2788_p7 }
  0x5e   : > { %2174 = dma.hbm_to_vmem [thread:$0]  (!%p2780_p6), %s3195_s7, 16, %s524_s23, [#allocation12]  }
  0x5f   : > { %p2455_p9 = pneg %p2454_p8  ;;  %p2461_p12 = por %p2460_p11, %p2459_p10 }
  0x61   : > { %p2462_p13 = pnand %p2461_p12, %p2455_p9 }
  0x63   : > { %2465 = shalt.err (!%p2462_p13)
}
  0x64   : > { %s3196_s9 = sld [smem:[#allocation34_spill]]  ;;  %s2477_s5 = scalar_lea.vmem %s570_s1, 256 }
  0x65   : > { %p2478_p0 = scmp.ne.s32.totalorder %s570_s1, %s2477_s5  ;;  %p2485_p4 = scmp.lt.s32.totalorder %s570_s1, %s570_s1 }
  0x66   : > { %p2486_p2 = scmp.lt.s32.totalorder %s2477_s5, %s2477_s5 }
  0x67   : > { %p2480_p3 = pnand %p2478_p0, %p2788_p7 }
  0x68   : > { %p2487_p5 = por %p2486_p2, %p2485_p4 }
  0x69   : > { %p2481_p1 = pneg %p2480_p3 }
  0x6a   : > { %2180 = dma.hbm_to_vmem [thread:$0]  (!%p2780_p6), %s3196_s9, 16, %s548_s15, [#allocation15]  }
  0x6b   : > { %p2488_p8 = pnand %p2487_p5, %p2481_p1 }
  0x6d   : > { %2491 = shalt.err (!%p2488_p8)
}
  0x6e   : > { %s3197_s12 = smov 64   ;;  %s3198_s14 = sld [smem:[#allocation37_spill]] }
  0x6f   : > { %s1924_s25 = sadd.s32 4294967294, %s2616_s19   ;;  %s50_s22 = sadd.s32 1, %s2612_s0 }
  0x70   : > { %s83_s15 = sadd.s32 1, %s2604_s29  ;;  %p52_p7 = scmp.ge.s32.totalorder %s50_s22, 2 }
  0x71   : > { %p90_p9 = scmp.ne.s32.totalorder %s2604_s29, %s2600_s28  ;;  %p91_p10 = scmp.eq.s32.totalorder %s2616_s19, 0 }
  0x72   : > { %p96_p11 = scmp.ne.s32.totalorder %s2600_s28, %s2596_s27  ;;  %s3224_s22 = smov (%p52_p7, %s50_s22), 0 }
  0x73   : > { %3199 = sst [smem:[#allocation26_spill]] %s3224_s22  ;;  %p2862_p12 = por %p91_p10, %p90_p9 }
  0x74   : > { %2183 = dma.hbm_to_vmem [thread:$0]  (!%p2780_p6), %s3198_s14, 256, %s570_s1, [#allocation18], %s3197_s12, %s3197_s12, %s2622_s13  }
  0x75   : > { %p3201_p13 = scmp.ne.s32.totalorder %s3187_s20, 0  ;;  %s80_s1 = ssub.s32 %s2612_s0, %s3224_s22 }
  0x76   : > { %s3203_s2 = sadd.s32 4294967295, %s2616_s19   ;;  %p81_p3 = scmp.eq.s32.totalorder %s80_s1, 0 }
  0x77   : > { %p2868_p6 = por %p3201_p13, %p96_p11  ;;  %p458_p0 = scmp.eq.s32.totalorder %s3203_s2, 1 }
  0x78   : > { %p464_p1 = scmp.eq.s32.totalorder %s1924_s25, 1  ;;  %p2199_p2 = scmp.lt.s32.totalorder %s2616_s19, 2 }
  0x79   : > { %p2876_p4 = por %p458_p0, %p90_p9  ;;  %s599_s12 = sand.u32 1, %s2604_s29  }
  0x7a   : > { %s2882_s23 = scalar_select %p81_p3, %s2604_s29, %s83_s15  }
  0x7b   : > { %p2884_p5 = por %p464_p1, %p96_p11  ;;  %s1934_s18 = sshll.u32 %s2612_s0, 4 }
  0x7c   : > { %s602_s26 = scalar_lea.vmem [#allocation5], %s599_s12  ;;  %s3206_s2 = sld [smem:[#allocation28_spill]] }
  0x7d   : > { %s609_s3 = sshll.u32 %s602_s26, 4  ;;  %p2895_p8 = pnand %p2199_p2, %p2862_p12  ;;  %s610_s3 = int_to_ptr.vmem [resolvable:$true] %s609_s3 }
  0x7e   : > { %s600_s15 = scalar_lea.sflag [#allocation6], %s599_s12  ;;  %s2505_s9 = scalar_lea.vmem %s610_s3, 16 }
  0x7f   : > { %p2494_p7 = pneg %p2895_p8  ;;  %p2506_p9 = scmp.ne.s32.totalorder %s610_s3, %s2505_s9 }
  0x80   : > { %s2627_s14 = smov [#allocation5]  }
  0x81   : > { %p2508_p10 = pnand %p2506_p9, %p2494_p7  ;;  %s2510_s26 = sshll.u32 %s2627_s14, 4  ;;  %s2511_s26 = int_to_ptr.vmem [resolvable:$false] %s2510_s26 }
  0x82   : > { %s607_s1 = scalar_lea.hbm %s3206_s2, %s1934_s18  ;;  %s2512_s22 = scalar_lea.vmem %s2511_s26, 32 }
  0x83   : > { %p2509_p11 = pneg %p2508_p10  ;;  %p2513_p13 = scmp.lt.s32.totalorder %s610_s3, %s2511_s26 }
  0x84   : > { %p2514_p0 = scmp.lt.s32.totalorder %s2512_s22, %s2505_s9 }
  0x86   : > { %p2515_p3 = por %p2514_p0, %p2513_p13 }
  0x88   : > { %p2516_p1 = pnand %p2515_p3, %p2509_p11 }
  0x8a   : > { %2519 = shalt.err (!%p2516_p1)
}
  0x8b   : > { %2187 = dma.hbm_to_vmem [thread:$0]  (!%p2895_p8), %s607_s1, 16, %s610_s3, %s600_s15  }
  0x8c   : > { %p3208_p12 = scmp.ne.s32.totalorder %s3188_s21, 0 }
  0x8d   : > { %s2906_s7 = sand.u32 (!%p3208_p12), 1, %s2600_s28  }
  0x8e   : > { %618 = sbr.rel (%p3208_p12) target bundleno = 2441 (0x989), region = 92  ;;  %s621_s8 = scalar_lea.sflag (!%p3208_p12), [#allocation6], %s2906_s7 }
  0x8f   : > { %s623_s14 = scalar_lea.vmem (!%p3208_p12), [#allocation5], %s2906_s7 }
  0x93   : > { %2571 = dma.done.wait (%p2868_p6), %s621_s8, 16  }
  0x94   : > { %2573 = vsyncadd (%p2868_p6), %s621_s8, 4294967280  ;;  %p3209_p2 = scmp.ne.s32.totalorder %s3187_s20, 0 }
  0x96   : > { %2575 = dma.done.wait (%p3209_p2), [#allocation9], 32  }
  0x97   : > { %2577 = vsyncadd (%p3209_p2), [#allocation9], 4294967264 }
  0x98   : > { %2579 = dma.done.wait (%p3209_p2), [#allocation12], 32  }
  0x99   : > { %2581 = vsyncadd (%p3209_p2), [#allocation12], 4294967264 }
  0x9a   : > { %2583 = dma.done.wait (%p3209_p2), [#allocation15], 272  }
  0x9b   : > { %2585 = vsyncadd (%p3209_p2), [#allocation15], 4294967024 }
  0x9c   : > { %2587 = dma.done.wait (%p3209_p2), [#allocation18], 256  }
  0x9d   : > { %2589 = vsyncadd (%p3209_p2), [#allocation18], 4294967040  ;;  %p707_p6 = scmp.lt.s32.totalorder %s2608_s30, 1  ;;  %s3210_s17 = sld [smem:[#allocation27_spill]]  ;;  %vm719_vm0 = vcmask 261120   ;;  %v2274_v12 = vld [vmem:[%s3153_s6 + $0x8] sm:$0xff]  }
  0x9e   : > { %v2275_v13 = vld [vmem:[#allocation14 + $0x8] sm:$0xff]   ;;  %v2628_v14 = vmov 0.0   ;;  %v2277_v16 = vld [vmem:[#allocation14] sm:$0xff]   ;;  %vm2629_vm1 = vmmov 0   ;;  %v1945_v24 = vld [vmem:[#allocation8] ss:$0 sm:$0xff] }
  0x9f   : > { %s708_s3 = scalar_select %p707_p6, %s2608_s30, 1  ;;  %2030 = vmatprep.subr.bf16.mxu0 %v2628_v14  ;;  %2038 = vmatprep.subr.bf16.mxu1 %v2628_v14  ;;  %v2276_v15 = vld [vmem:[%s3153_s6] sm:$0xff]   ;;  %v1946_v26 = vld [vmem:[#allocation10] ss:$0 sm:$0xff]  ;;  %v1947_v37 = vld [vmem:[#allocation13] ss:$0 sm:$0xff] }
  0xa0   : > { %2031 = vmatpush3.bf16.msra.mxu0 %v2274_v12  ;;  %2039 = vmatpush3.bf16.msra.mxu1 %v2275_v13  ;;  %v2278_v31 = vld [vmem:[%s3151_s4 + $0x8] sm:$0xff]   ;;  %v2279_v34 = vld [vmem:[%s3151_s4] sm:$0xff]   ;;  %vm896_vm2 = vcmask 60416   ;;  %vm1046_vm3 = vcmask 1043456   ;;  %s2630_s8 = smov 120   ;;  %vm1042_vm4 = vcmask 64512  }
  0xa1   : > { %s1944_s9 = sshll.u32 %s708_s3, 3  ;;  %2032 = vmatprep.subr.bf16.mxu0 %v2628_v14  ;;  %2040 = vmatprep.subr.bf16.mxu1 %v2628_v14  ;;  %v1951_v38 = vld [vmem:[#allocation16] ss:$0 sm:$0xff]  ;;  %v1960_v51 = vld [vmem:[#allocation11] ss:$0 sm:$0xff]  ;;  %s2631_s3 = smov 112  }
  0xa2   : > { %2034 = vmatprep.mubr.msk.bf16.mxu0 %vm2629_vm1, %v2628_v14  ;;  %2042 = vmatprep.mubr.msk.bf16.mxu1 %vm2629_vm1, %v2628_v14  ;;  %v1964_v13 = vld [vmem:[%s623_s14] ss:$0 sm:$0xff]  ;;  %s2633_s14 = smov 8   ;;  %s2634_s21 = smov 16   ;;  %vm1265_vm5 = vcmask 130112   ;;  %vm1381_vm6 = vcmask 195712  }
  0xa3   : > { %s710_s13 = scalar_lea.vmem %s3210_s17, %s1944_s9  ;;  %s2632_s9 = smov 104   ;;  %vm1497_vm7 = vcmask 261312   ;;  %vm1705_vm8 = vcmask 523264  }
  0xa4   : > { %v2935_v0 = vld [vmem:[%s710_s13] sm:$0xff]  ;;  %2033 = vmatpush3.bf16.msra.mxu0 %v2276_v15  ;;  %2041 = vmatpush3.bf16.msra.mxu1 %v2277_v16  ;;  %s2635_s12 = smov 24   ;;  %s3212_s22 = sld [smem:[#allocation36_spill]] }
  0xa5   : > { %v720_v1 = vsel %vm719_vm0, %v2935_v0, 0.0  ;;  %2046 = vmatprep.subr.bf16.mxu0 %v2628_v14  ;;  %2054 = vmatprep.subr.bf16.mxu1 %v2628_v14  ;;  %s3213_s1 = sld [smem:[#allocation38_spill]]  ;;  %s1943_s25 = sshll.u32 %s2906_s7, 3 }
  0xa6   : > { %721 = vadd.xlane.f32.xlu0 %v720_v1  ;;  %s3215_s17 = sld [smem:[#allocation40_spill]] }
  0xaa   : > { %938 = vadd.xlane.f32.xlu0 %v720_v1 }
 0x12f   : > { %v722_v2 = vpop.xlane.xlu0 %721 }
 0x130   : > { %v724_v3 = vmul.f32 0.03125, %v722_v2 }
 0x132   : > { %v725_v4 = vsub.f32 %v2935_v0, %v724_v3 }
 0x133   : > { %v939_v5 = vpop.xlane.xlu0 %938 }
 0x134   : > { %v941_v6 = vmul.f32 0.03125, %v939_v5  ;;  %v726_v7 = vmul.f32 %v725_v4, %v725_v4 }
 0x136   : > { %v942_v8 = vsub.f32 %v2935_v0, %v941_v6  ;;  %v727_v9 = vsel %vm719_vm0, %v726_v7, 0.0 }
 0x137   : > { %728 = vadd.xlane.f32.xlu1 %v727_v9 }
 0x138   : > { %v943_v10 = vmul.f32 %v942_v8, %v942_v8 }
 0x13a   : > { %v944_v11 = vsel %vm719_vm0, %v943_v10, 0.0 }
 0x13b   : > { %945 = vadd.xlane.f32.xlu1 %v944_v11 }
 0x1c0   : > { %v729_v17 = vpop.xlane.xlu1 %728 }
 0x1c1   : > { %v730_v18 = vmul.f32 0.03125, %v729_v17 }
 0x1c3   : > { %v731_v19 = vadd.f32 1e-06, %v730_v18 }
 0x1c4   : > { %v946_v20 = vpop.xlane.xlu1 %945 }
 0x1c5   : > { %2288 = vrsqrt.f32 %v731_v19  ;;  %v947_v21 = vmul.f32 0.03125, %v946_v20 }
 0x1c7   : > { %v948_v22 = vadd.f32 1e-06, %v947_v21 }
 0x1c9   : > { %2290 = vrsqrt.f32 %v948_v22 }
 0x1d2   : > { %v2289_v23 = vpop.eup %2288 }
 0x1d3   : > { %v733_v25 = vmul.f32 %v2289_v23, %v725_v4 }
 0x1d5   : > { %v740_v27 = vmul.f32 %v1945_v24, %v733_v25 }
 0x1d6   : > { %v2291_v28 = vpop.eup %2290 }
 0x1d7   : > { %v950_v29 = vmul.f32 %v2291_v28, %v942_v8  ;;  %v747_v30 = vadd.f32 %v1946_v26, %v740_v27 }
 0x1d9   : > { %v748_v32 = vpack.c.bf16 %v747_v30, %v747_v30  ;;  %v957_v33 = vmul.f32 %v1945_v24, %v950_v29 }
 0x1db   : > { %2035 = vmatmul.mubr.msk.bf16.vlgmr.msra.gmra.mxu0 %vm719_vm0, %v748_v32  ;;  %2043 = vmatmul.mubr.msk.bf16.vlgmr.msra.gmra.mxu1 %vm719_vm0, %v748_v32  ;;  %v964_v35 = vadd.f32 %v1946_v26, %v957_v33 }
 0x1dc   : > { %2047 = vmatpush3.bf16.msra.mxu0 %v2278_v31  ;;  %2050 = vmatprep.mubr.msk.bf16.mxu0 %vm2629_vm1, %v2628_v14 }
 0x1dd   : > { %2048 = vmatprep.subr.bf16.mxu0 %v2628_v14  ;;  %2056 = vmatprep.mubr.msk.bf16.mxu1 %vm2629_vm1, %v2628_v14  ;;  %v965_v36 = vpack.c.bf16 %v964_v35, %v964_v35 }
 0x1e0   : > { %2049 = vmatpush3.bf16.msra.mxu0 %v2279_v34 }
 0x1e1   : > { %2060 = vmatprep.subr.bf16.mxu0 %v2628_v14 }
 0x1e3   : > { %2051 = vmatmul.mubr.msk.bf16.vlgmr.msra.gmra.mxu0 %vm719_vm0, %v965_v36 }
 0x1e4   : > { %2062 = vmatprep.mubr.msk.bf16.mxu0 %vm2629_vm1, %v2628_v14 }
 0x29b   : > { %v809_v39 = vpop.f32.mrf.mxu0  ;;  %v872_v40 = vpop.f32.mrf.mxu1 }
 0x29c   : > { %v810_v41 = vadd.f32 %v1947_v37, %v809_v39  ;;  %v873_v42 = vadd.f32 %v1951_v38, %v872_v40 }
 0x29d   : > { %v2036_v43 = vpop.f32.mrf.mxu0  ;;  %v2044_v44 = vpop.f32.mrf.mxu1 }
 0x29e   : > { %v878_v45 = vpack.c.bf16 %v810_v41, %v810_v41  ;;  %v2976_v46 = vpack.c.bf16 %v873_v42, %v873_v42 }
 0x29f   : > { %v812_v47 = vpop.f32.mrf.mxu0  ;;  %v875_v48 = vpop.f32.mrf.mxu1 }
 0x2a0   : > { %898 = vst.msk [vmem:[#allocation3] sm:$0xf] %vm896_vm2, %v2976_v46  ;;  %879 = vxpose.xlu1.c.b16.start.end [1/1] (short) (narrow) %v878_v45, 32 }
 0x2a1   : > { %v2037_v49 = vpop.f32.mrf.mxu0  ;;  %v2045_v50 = vpop.f32.mrf.mxu1 }
 0x2a3   : > { %v1026_v52 = vpop.f32.mrf.mxu0 }
 0x2a4   : > { %v1027_v53 = vadd.f32 %v1960_v51, %v1026_v52 }
 0x2a5   : > { %v2052_v54 = vpop.f32.mrf.mxu0 }
 0x2a6   : > { %v1032_v55 = vmul.f32 0.35355338, %v1027_v53 }
 0x2a7   : > { %v1029_v56 = vpop.f32.mrf.mxu0  ;;  %v1100_v57 = vld [vmem:[#allocation3] sm:$0xf] }
 0x2a8   : > { %v1033_v58 = vpack.c.bf16 %v1032_v55, %v1032_v55  ;;  %v1105_v59 = vsel %vm1046_vm3, %v1100_v57, 0 }
 0x2a9   : > { %v2053_v60 = vpop.f32.mrf.mxu0  ;;  %2061 = vmatpush3.bf16.msra.mxu0 %v1105_v59 }
 0x2aa   : > { %1153 = vrot.lane.b32.xlu0 %v1033_v58, %s2630_s8  ;;  %2072 = vmatprep.subr.bf16.mxu0 %v2628_v14 }
 0x2ae   : > { %1269 = vrot.lane.b32.xlu0 %v1033_v58, %s2631_s3 }
 0x2b2   : > { %1385 = vrot.lane.b32.xlu0 %v1033_v58, %s2632_s9 }
 0x302   : > { %v887_v61 = vpop.trf.xlu1 }
 0x303   : > { %897 = vst.msk [vmem:[#allocation2] sm:$0xf] %vm896_vm2, %v887_v61  ;;  %v1955_v62 = vcombine.high %v887_v61, %v887_v61 }
 0x305   : > { %904 = vst.msk [vmem:[#allocation2 + $0x4] sm:$0xf] %vm896_vm2, %v1955_v62 }
 0x306   : > { %v888_v63 = vpop.trf.xlu1 }
 0x307   : > { %914 = vst.msk [vmem:[#allocation2 + $0x8] sm:$0xf] %vm896_vm2, %v888_v63  ;;  %v1957_v1 = vcombine.high %v888_v63, %v888_v63 }
 0x309   : > { %925 = vst.msk [vmem:[#allocation2 + $0xc] sm:$0xf] %vm896_vm2, %v1957_v1 }
 0x30a   : > { %v1041_v2 = vld [vmem:[#allocation2] sm:$0xf] }
 0x30b   : > { %v1048_v3 = vsel %vm1046_vm3, %v1041_v2, 0 }
 0x30c   : > { %2055 = vmatpush3.bf16.msra.mxu1 %v1048_v3  ;;  %v1151_v4 = vld [vmem:[#allocation2 + $0x4] sm:$0xf] }
 0x30d   : > { %2066 = vmatprep.subr.bf16.mxu1 %v2628_v14  ;;  %v1159_v5 = vsel %vm1046_vm3, %v1151_v4, 0 }
 0x30e   : > { %v1268_v6 = vld [vmem:[#allocation2 + $0x8] sm:$0xf] }
 0x30f   : > { %2057 = vmatmul.mubr.msk.bf16.vlgmr.msra.gmra.mxu1 %vm1042_vm4, %v1033_v58  ;;  %v1275_v7 = vsel %vm1046_vm3, %v1268_v6, 0 }
 0x310   : > { %2067 = vmatpush3.bf16.msra.mxu1 %v1159_v5  ;;  %2068 = vmatprep.mubr.msk.bf16.mxu1 %vm2629_vm1, %v2628_v14  ;;  %v1384_v9 = vld [vmem:[#allocation2 + $0xc] sm:$0xf] }
 0x311   : > { %2078 = vmatprep.subr.bf16.mxu1 %v2628_v14  ;;  %v1391_v10 = vsel %vm1046_vm3, %v1384_v9, 0 }
 0x31c   : > { %v1154_v8 = vpop.permute.xlu0 %1153 }
 0x31d   : > { %2069 = vmatmul.mubr.msk.bf16.vlgmr.msra.gmra.mxu1 %vm1042_vm4, %v1154_v8 }
 0x31e   : > { %2079 = vmatpush3.bf16.msra.mxu1 %v1275_v7  ;;  %2080 = vmatprep.mubr.msk.bf16.mxu1 %vm2629_vm1, %v2628_v14 }
 0x31f   : > { %2090 = vmatprep.subr.bf16.mxu1 %v2628_v14 }
 0x320   : > { %v1270_v11 = vpop.permute.xlu0 %1269 }
 0x324   : > { %v1386_v12 = vpop.permute.xlu0 %1385 }
 0x325   : > { %2081 = vmatmul.mubr.msk.bf16.vlgmr.msra.gmra.mxu1 %vm1042_vm4, %v1270_v11 }
 0x326   : > { %2091 = vmatpush3.bf16.msra.mxu1 %v1391_v10  ;;  %2092 = vmatprep.mubr.msk.bf16.mxu1 %vm2629_vm1, %v2628_v14 }
 0x327   : > { %2102 = vmatprep.subr.bf16.mxu1 %v2628_v14 }
 0x32d   : > { %2093 = vmatmul.mubr.msk.bf16.vlgmr.msra.gmra.mxu1 %vm1042_vm4, %v1386_v12 }
 0x32e   : > { %2106 = vmatprep.mubr.msk.bf16.mxu1 %vm2629_vm1, %v2628_v14 }
 0x3cf   : > { %v1084_v15 = vpop.f32.mrf.mxu1 }
 0x3d0   : > { %v1085_v16 = vadd.f32 %v1964_v13, %v1084_v15 }
 0x3d1   : > { %v2058_v17 = vpop.f32.mrf.mxu1 }
 0x3d2   : > { %v1090_v18 = vsel %vm1042_vm4, %v1085_v16, -inf }
 0x3d3   : > { %1091 = vmax.xlane.f32.xlu0 %v1090_v18  ;;  %v1087_v19 = vpop.f32.mrf.mxu1 }
 0x3d5   : > { %v2059_v20 = vpop.f32.mrf.mxu1 }
 0x3dd   : > { %v1195_v21 = vpop.f32.mrf.mxu1 }
 0x3de   : > { %v1196_v22 = vadd.f32 %v1964_v13, %v1195_v21 }
 0x3df   : > { %v2070_v23 = vpop.f32.mrf.mxu1 }
 0x3e0   : > { %v1201_v24 = vsel %vm1042_vm4, %v1196_v22, -inf }
 0x3e1   : > { %1202 = vmax.xlane.f32.xlu1 %v1201_v24  ;;  %v1198_v25 = vpop.f32.mrf.mxu1 }
 0x3e3   : > { %v2071_v26 = vpop.f32.mrf.mxu1 }
 0x3e5   : > { %v1311_v27 = vpop.f32.mrf.mxu1 }
 0x3e6   : > { %v1312_v28 = vadd.f32 %v1964_v13, %v1311_v27 }
 0x3e7   : > { %v2082_v29 = vpop.f32.mrf.mxu1 }
 0x3e8   : > { %v1317_v30 = vsel %vm1042_vm4, %v1312_v28, -inf }
 0x3e9   : > { %1318 = vmax.xlane.f32.xlu0 %v1317_v30  ;;  %v1314_v31 = vpop.f32.mrf.mxu1 }
 0x3eb   : > { %v2083_v32 = vpop.f32.mrf.mxu1 }
 0x3ec   : > { %v2280_v32 = vld [vmem:[%s3157_s10 + $0x8] sm:$0xff]  }
 0x3ed   : > { %v1427_v33 = vpop.f32.mrf.mxu1  ;;  %2103 = vmatpush3.bf16.msra.mxu1 %v2280_v32 }
 0x3ee   : > { %v1428_v37 = vadd.f32 %v1964_v13, %v1427_v33  ;;  %v2281_v33 = vld [vmem:[%s3157_s10] sm:$0xff]   ;;  %2104 = vmatprep.subr.bf16.mxu1 %v2628_v14 }
 0x3ef   : > { %v2094_v34 = vpop.f32.mrf.mxu1 }
 0x3f0   : > { %v1433_v38 = vsel %vm1042_vm4, %v1428_v37, -inf }
 0x3f1   : > { %v1430_v35 = vpop.f32.mrf.mxu1  ;;  %2105 = vmatpush3.bf16.msra.mxu1 %v2281_v33 }
 0x3f2   : > { %915 = vrot.lane.b32.xlu1 %v2976_v46, %s2631_s3  ;;  %2118 = vmatprep.subr.bf16.mxu1 %v2628_v14  ;;  %s1990_s3 = sshll.u32 %s2608_s30, 7  ;;  %s1752_s30 = scalar_lea.sflag [#allocation7], %s2906_s7 }
 0x3f3   : > { %v2095_v36 = vpop.f32.mrf.mxu1  ;;  %s3098_s13 = scalar_lea.hbm %s3215_s17, %s1990_s3 }
 0x3ff   : > { %908 = vrot.lane.b32.xlu0 %v2976_v46, %s2630_s8  ;;  %s3214_s8 = sld [smem:[#allocation39_spill]] }
 0x416   : > { %1434 = vmax.xlane.f32.xlu1 %v1433_v38 }
 0x427   : > { %926 = vrot.lane.b32.xlu1 %v2976_v46, %s2632_s9  ;;  %s3211_s9 = sld [smem:[#allocation35_spill]] }
 0x45c   : > { %v1092_v39 = vpop.xlane.xlu0 %1091 }
 0x45d   : > { %v1093_v40 = vsub.f32 %v1085_v16, %v1092_v39 }
 0x45f   : > { %v1094_v41 = vmul.f32 1.442695, %v1093_v40 }
 0x461   : > { %2292 = vpow2.f32 %v1094_v41 }
 0x46a   : > { %v1203_v42 = vpop.xlane.xlu1 %1202 }
 0x46b   : > { %v1204_v43 = vsub.f32 %v1196_v22, %v1203_v42 }
 0x46d   : > { %v1205_v44 = vmul.f32 1.442695, %v1204_v43 }
 0x46e   : > { %v2293_v45 = vpop.eup %2292  ;;  %v916_v47 = vpop.permute.xlu1 %915 }
 0x46f   : > { %2294 = vpow2.f32 %v1205_v44  ;;  %919 = vst.msk [vmem:[#allocation3 + $0x8] sm:$0xf] %vm896_vm2, %v916_v47  ;;  %v1099_v48 = vpack.c.bf16 %v2293_v45, %v2293_v45  ;;  %v1096_v8 = vsel %vm1042_vm4, %v2293_v45, 0.0  ;;  %v1973_v45 = vld [vmem:[%s3158_s11] ss:$0 sm:$0xff] }
 0x471   : > { %2063 = vmatmul.mubr.msk.bf16.vlgmr.msra.gmra.mxu0 %vm1042_vm4, %v1099_v48 }
 0x472   : > { %v1319_v49 = vpop.xlane.xlu0 %1318  ;;  %2074 = vmatprep.mubr.msk.bf16.mxu0 %vm2629_vm1, %v2628_v14 }
 0x473   : > { %v1320_v46 = vsub.f32 %v1312_v28, %v1319_v49 }
 0x475   : > { %v1321_v50 = vmul.f32 1.442695, %v1320_v46 }
 0x476   : > { %v909_v51 = vpop.permute.xlu0 %908  ;;  %v1328_v56 = vld [vmem:[#allocation3 + $0x8] sm:$0xf] }
 0x477   : > { %2296 = vpow2.f32 %v1321_v50  ;;  %912 = vst.msk [vmem:[#allocation3 + $0x4] sm:$0xf] %vm896_vm2, %v909_v51  ;;  %v1333_v58 = vsel %vm1046_vm3, %v1328_v56, 0 }
 0x47c   : > { %v2295_v52 = vpop.eup %2294 }
 0x47d   : > { %v1207_v53 = vsel %vm1042_vm4, %v2295_v52, 0.0  ;;  %v1210_v57 = vpack.c.bf16 %v2295_v52, %v2295_v52 }
 0x47e   : > { %1208 = vadd.xlane.f32.xlu0 %v1207_v53  ;;  %v1212_v54 = vld [vmem:[#allocation3 + $0x4] sm:$0xf] }
 0x47f   : > { %v1217_v55 = vsel %vm1046_vm3, %v1212_v54, 0 }
 0x480   : > { %2073 = vmatpush3.bf16.msra.mxu0 %v1217_v55 }
 0x481   : > { %2084 = vmatprep.subr.bf16.mxu0 %v2628_v14 }
 0x483   : > { %2075 = vmatmul.mubr.msk.bf16.vlgmr.msra.gmra.mxu0 %vm1042_vm4, %v1210_v57 }
 0x484   : > { %v2297_v59 = vpop.eup %2296  ;;  %2085 = vmatpush3.bf16.msra.mxu0 %v1333_v58  ;;  %2086 = vmatprep.mubr.msk.bf16.mxu0 %vm2629_vm1, %v2628_v14  ;;  %v2282_v58 = vld [vmem:[#allocation17 + $0x8] sm:$0xff]  }
 0x485   : > { %v1323_v60 = vsel %vm1042_vm4, %v2297_v59, 0.0  ;;  %2096 = vmatprep.subr.bf16.mxu0 %v2628_v14  ;;  %v1326_v61 = vpack.c.bf16 %v2297_v59, %v2297_v59  ;;  %v2283_v59 = vld [vmem:[#allocation17] sm:$0xff]  }
 0x486   : > { %1324 = vadd.xlane.f32.xlu1 %v1323_v60  ;;  %v2285_v60 = vld [vmem:[%s3163_s16 + $0x10] sm:$0xff]  }
 0x48b   : > { %2087 = vmatmul.mubr.msk.bf16.vlgmr.msra.gmra.mxu0 %vm1042_vm4, %v1326_v61 }
 0x48c   : > { %2098 = vmatprep.mubr.msk.bf16.mxu0 %vm2629_vm1, %v2628_v14 }
 0x49f   : > { %v1435_v62 = vpop.xlane.xlu1 %1434 }
 0x4a0   : > { %v1436_v63 = vsub.f32 %v1428_v37, %v1435_v62 }
 0x4a2   : > { %v1437_v1 = vmul.f32 1.442695, %v1436_v63 }
 0x4a3   : > { %v927_v2 = vpop.permute.xlu1 %926 }
 0x4a4   : > { %2298 = vpow2.f32 %v1437_v1  ;;  %930 = vst.msk [vmem:[#allocation3 + $0xc] sm:$0xf] %vm896_vm2, %v927_v2  ;;  %v1977_v2 = vld [vmem:[%s3211_s9] ss:$0 sm:$0xff]  ;;  %s706_s9 = scalar_lea.vmem [#allocation19], %s1943_s25 }
 0x4ab   : > { %v1444_v3 = vld [vmem:[#allocation3 + $0xc] sm:$0xf] }
 0x4ac   : > { %v1449_v4 = vsel %vm1046_vm3, %v1444_v3, 0 }
 0x4ad   : > { %2097 = vmatpush3.bf16.msra.mxu0 %v1449_v4  ;;  %v1978_v4 = vld [vmem:[%s3212_s22] ss:$0 sm:$0xff] }
 0x4ae   : > { %2110 = vmatprep.subr.bf16.mxu0 %v2628_v14 }
 0x4b1   : > { %v2299_v5 = vpop.eup %2298 }
 0x4b2   : > { %v1439_v6 = vsel %vm1042_vm4, %v2299_v5, 0.0  ;;  %v1442_v7 = vpack.c.bf16 %v2299_v5, %v2299_v5 }
 0x4b3   : > { %1440 = vadd.xlane.f32.xlu0 %v1439_v6 }
 0x4b4   : > { %2099 = vmatmul.mubr.msk.bf16.vlgmr.msra.gmra.mxu0 %vm1042_vm4, %v1442_v7 }
 0x4b5   : > { %2114 = vmatprep.mubr.msk.bf16.mxu0 %vm2629_vm1, %v2628_v14  ;;  %2111 = vmatpush3.bf16.msra.mxu0 %v2282_v58 }
 0x4b6   : > { %2112 = vmatprep.subr.bf16.mxu0 %v2628_v14 }
 0x4b7   : > { %1097 = vadd.xlane.f32.xlu0 %v1096_v8  ;;  %v2286_v8 = vld [vmem:[%s3163_s16 + $0x8] sm:$0xff]  }
 0x4b9   : > { %2113 = vmatpush3.bf16.msra.mxu0 %v2283_v59 }
 0x507   : > { %v1209_v10 = vpop.xlane.xlu0 %1208 }
 0x508   : > { %2300 = vrcp.f32 %v1209_v10  ;;  %v1979_v10 = vld [vmem:[%s3213_s1] ss:$0 sm:$0xff] }
 0x50f   : > { %v1325_v15 = vpop.xlane.xlu1 %1324 }
 0x510   : > { %2302 = vrcp.f32 %v1325_v15 }
 0x515   : > { %v2301_v18 = vpop.eup %2300 }
 0x51d   : > { %v2303_v24 = vpop.eup %2302 }
 0x531   : > { %v1141_v9 = vpop.f32.mrf.mxu0 }
 0x533   : > { %v2064_v11 = vpop.f32.mrf.mxu0 }
 0x535   : > { %v1144_v12 = vpop.f32.mrf.mxu0 }
 0x537   : > { %v2065_v13 = vpop.f32.mrf.mxu0 }
 0x53c   : > { %v1441_v16 = vpop.xlane.xlu0 %1440 }
 0x540   : > { %v1098_v17 = vpop.xlane.xlu0 %1097 }
 0x541   : > { %2304 = vrcp.f32 %v1098_v17 }
 0x542   : > { %2306 = vrcp.f32 %v1441_v16 }
 0x543   : > { %v1253_v19 = vpop.f32.mrf.mxu0 }
 0x544   : > { %v1260_v20 = vmul.f32 %v2301_v18, %v1253_v19 }
 0x545   : > { %v2076_v21 = vpop.f32.mrf.mxu0 }
 0x546   : > { %1262 = vrot.lane.b32.xlu1 %v1260_v20, %s2633_s14  ;;  %s1766_s14 = sshll.u32 %s706_s9, 4  ;;  %s3100_s14 = int_to_ptr.vmem [resolvable:$true] %s1766_s14 }
 0x547   : > { %v1256_v22 = vpop.f32.mrf.mxu0  ;;  %s2520_s20 = scalar_lea.vmem %s3100_s14, 128 }
 0x548   : > { %p2521_p8 = scmp.ne.s32.totalorder %s3100_s14, %s2520_s20 }
 0x549   : > { %v2077_v23 = vpop.f32.mrf.mxu0 }
 0x54a   : > { %p2522_p7 = pnand %p2521_p8, %p2876_p4 }
 0x54b   : > { %v1369_v25 = vpop.f32.mrf.mxu0 }
 0x54c   : > { %v1376_v26 = vmul.f32 %v2303_v24, %v1369_v25  ;;  %p2523_p9 = pneg %p2522_p7 }
 0x54d   : > { %v2088_v27 = vpop.f32.mrf.mxu0 }
 0x54e   : > { %v2305_v28 = vpop.eup %2304  ;;  %1378 = vrot.lane.b32.xlu0 %v1376_v26, %s2634_s21 }
 0x54f   : > { %v1372_v29 = vpop.f32.mrf.mxu0  ;;  %v1148_v30 = vmul.f32 %v2305_v28, %v1141_v9  ;;  %v2307_v34 = vpop.eup %2306  ;;  %v2287_v9 = vld [vmem:[%s3163_s16] sm:$0xff]  }
 0x551   : > { %v2089_v31 = vpop.f32.mrf.mxu0  ;;  %1149 = vst.msk [vmem:[#allocation4] sm:$0xff] %vm1042_vm4, %v1148_v30 }
 0x574   : > { %v1485_v35 = vpop.f32.mrf.mxu0 }
 0x575   : > { %v1492_v36 = vmul.f32 %v2307_v34, %v1485_v35 }
 0x576   : > { %v2100_v37 = vpop.f32.mrf.mxu0 }
 0x577   : > { %1494 = vrot.lane.b32.xlu1 %v1492_v36, %s2635_s12  ;;  %s2636_s12 = smov [#allocation19]  }
 0x578   : > { %v1488_v38 = vpop.f32.mrf.mxu0  ;;  %s2524_s18 = sshll.u32 %s2636_s12, 4  ;;  %s2525_s18 = int_to_ptr.vmem [resolvable:$false] %s2524_s18 }
 0x579   : > { %s2526_s2 = scalar_lea.vmem %s2525_s18, 256  ;;  %p2527_p10 = scmp.lt.s32.totalorder %s3100_s14, %s2525_s18 }
 0x57a   : > { %v2101_v39 = vpop.f32.mrf.mxu0  ;;  %p2528_p11 = scmp.lt.s32.totalorder %s2526_s2, %s2520_s20 }
 0x57c   : > { %p2529_p13 = por %p2528_p11, %p2527_p10 }
 0x57e   : > { %p2530_p0 = pnand %p2529_p13, %p2523_p9 }
 0x5b8   : > { %v1263_v40 = vpop.permute.xlu1 %1262 }
 0x5b9   : > { %1266 = vst.msk [vmem:[#allocation4] sm:$0xff] %vm1265_vm5, %v1263_v40 }
 0x5c0   : > { %v1379_v41 = vpop.permute.xlu0 %1378 }
 0x5c1   : > { %1382 = vst.msk [vmem:[#allocation4] sm:$0xff] %vm1381_vm6, %v1379_v41 }
 0x5e9   : > { %v1495_v42 = vpop.permute.xlu1 %1494 }
 0x5ea   : > { %1498 = vst.msk [vmem:[#allocation4] sm:$0xff] %vm1497_vm7, %v1495_v42 }
 0x5f1   : > { %v1499_v43 = vld [vmem:[#allocation4] sm:$0xff] }
 0x5f2   : > { %v1500_v44 = vpack.c.bf16 %v1499_v43, %v1499_v43 }
 0x5f4   : > { %2107 = vmatmul.mubr.msk.bf16.vlgmr.msra.gmra.mxu1 %vm719_vm0, %v1500_v44 }
 0x5f5   : > { %2126 = vmatprep.mubr.msk.bf16.mxu1 %vm2629_vm1, %v2628_v14 }
 0x6b4   : > { %v1561_v47 = vpop.f32.mrf.mxu1 }
 0x6b5   : > { %v1562_v48 = vadd.f32 %v1973_v45, %v1561_v47 }
 0x6b6   : > { %v2108_v49 = vpop.f32.mrf.mxu1 }
 0x6b7   : > { %v1567_v46 = vadd.f32 %v1562_v48, %v2935_v0  ;;  %v2284_v0 = vld [vmem:[%s3163_s16 + $0x18] sm:$0xff]  }
 0x6b8   : > { %v1564_v50 = vpop.f32.mrf.mxu1  ;;  %2119 = vmatpush3.bf16.msra.mxu1 %v2284_v0 }
 0x6b9   : > { %v1570_v51 = vsel %vm719_vm0, %v1567_v46, 0.0  ;;  %2120 = vmatprep.subr.bf16.mxu1 %v2628_v14 }
 0x6ba   : > { %1571 = vadd.xlane.f32.xlu1 %v1570_v51  ;;  %v2109_v52 = vpop.f32.mrf.mxu1 }
 0x6bc   : > { %2121 = vmatpush3.bf16.msra.mxu1 %v2285_v60 }
 0x6bd   : > { %2122 = vmatprep.subr.bf16.mxu1 %v2628_v14 }
 0x6c0   : > { %2123 = vmatpush3.bf16.msra.mxu1 %v2286_v8 }
 0x6c1   : > { %2124 = vmatprep.subr.bf16.mxu1 %v2628_v14  ;;  %v1983_v14 = vld [vmem:[%s3214_s8] ss:$0 sm:$0xff] }
 0x6c4   : > { %2125 = vmatpush3.bf16.msra.mxu1 %v2287_v9 }
 0x743   : > { %v1572_v53 = vpop.xlane.xlu1 %1571 }
 0x744   : > { %v1573_v54 = vmul.f32 0.03125, %v1572_v53 }
 0x746   : > { %v1574_v55 = vsub.f32 %v1567_v46, %v1573_v54 }
 0x748   : > { %v1575_v56 = vmul.f32 %v1574_v55, %v1574_v55 }
 0x74a   : > { %v1576_v57 = vsel %vm719_vm0, %v1575_v56, 0.0 }
 0x74b   : > { %1577 = vadd.xlane.f32.xlu0 %v1576_v57 }
 0x7d4   : > { %v1578_v61 = vpop.xlane.xlu0 %1577 }
 0x7d5   : > { %v1579_v62 = vmul.f32 0.03125, %v1578_v61 }
 0x7d7   : > { %v1580_v63 = vadd.f32 1e-06, %v1579_v62 }
 0x7d9   : > { %2308 = vrsqrt.f32 %v1580_v63 }
 0x7e6   : > { %v2309_v1 = vpop.eup %2308 }
 0x7e7   : > { %v1582_v3 = vmul.f32 %v2309_v1, %v1574_v55 }
 0x7e9   : > { %v1589_v5 = vmul.f32 %v1977_v2, %v1582_v3 }
 0x7eb   : > { %v1596_v6 = vadd.f32 %v1978_v4, %v1589_v5 }
 0x7ed   : > { %v1597_v7 = vpack.c.bf16 %v1596_v6, %v1596_v6 }
 0x7ef   : > { %2115 = vmatmul.mubr.msk.bf16.vlgmr.msra.gmra.mxu0 %vm719_vm0, %v1597_v7 }
 0x8af   : > { %v1658_v11 = vpop.f32.mrf.mxu0 }
 0x8b0   : > { %v1659_v12 = vadd.f32 %v1979_v10, %v1658_v11 }
 0x8b1   : > { %v2116_v13 = vpop.f32.mrf.mxu0 }
 0x8b2   : > { %v1664_v15 = vmax.f32 %v1659_v12, 0.0 }
 0x8b3   : > { %v1661_v16 = vpop.f32.mrf.mxu0 }
 0x8b4   : > { %v1665_v17 = vpack.c.bf16 %v1664_v15, %v1664_v15 }
 0x8b5   : > { %v2117_v18 = vpop.f32.mrf.mxu0 }
 0x8b6   : > { %2127 = vmatmul.mubr.msk.bf16.vlgmr.msra.gmra.mxu1 %vm1705_vm8, %v1665_v17 }
 0x976   : > { %v1743_v19 = vpop.f32.mrf.mxu1 }
 0x977   : > { %v1744_v20 = vadd.f32 %v1983_v14, %v1743_v19 }
 0x978   : > { %v2128_v21 = vpop.f32.mrf.mxu1 }
 0x979   : > { %v1749_v22 = vadd.f32 %v1744_v20, %v1567_v46 }
 0x97a   : > { %v1746_v23 = vpop.f32.mrf.mxu1 }
 0x97b   : > { %1750 = vst.msk [vmem:[%s706_s9] sm:$0xff] %vm719_vm0, %v1749_v22 }
 0x97c   : > { %v2129_v24 = vpop.f32.mrf.mxu1 }
 0x97d   : > { %2533 = shalt.err (!%p2530_p0)
}
 0x97e   : > { %s2534_s1 = scalar_lea.hbm %s3098_s13, 128  ;;  %s2538_s15 = scalar_lea.hbm %s3215_s17, 256 }
 0x97f   : > { %p2535_p3 = scmp.ne.s32.totalorder %s3098_s13, %s2534_s1  ;;  %p2539_p2 = scmp.lt.s32.totalorder %s3098_s13, %s3215_s17 }
 0x980   : > { %p2540_p6 = scmp.lt.s32.totalorder %s2538_s15, %s2534_s1 }
 0x981   : > { %p2536_p1 = pnand %p2535_p3, %p2876_p4 }
 0x982   : > { %p2541_p8 = por %p2540_p6, %p2539_p2 }
 0x983   : > { %p2537_p12 = pneg %p2536_p1 }
 0x985   : > { %p2542_p7 = pnand %p2541_p8, %p2537_p12 }
 0x987   : > { %2545 = shalt.err (!%p2542_p7)
}
 0x988   : > { %2160 = dma.vmem_to_hbm [thread:$0]  (%p2876_p4), %s3100_s14, 128, %s3098_s13, %s1752_s30  }
 0x989 PF: > { %s1778_s3 = sand.u32 1, %s2596_s27   ;;  %p3216_p9 = scmp.ge.s32.totalorder %s2616_s19, 2 }
 0x98a   : > { %s1779_s9 = scalar_lea.sflag [#allocation7], %s1778_s3 }
 0x98b   : > { %p2189_p10 = pnand %p3216_p9, %p2884_p5 }
 0x98d   : > { %p2190_p11 = pneg %p2189_p10 }
 0x98f   : > { %2591 = dma.done.wait (%p2190_p11), %s1779_s9, 128  }
 0x990   : > { %2593 = vsyncadd (%p2190_p11), %s1779_s9, 4294967168  ;;  %s38_s19 = sadd.s32 1, %s2616_s19   ;;  %s3217_s24 = sld [smem:[#allocation26_spill]] }
 0x991   : > { %p35_p13 = scmp.ge.s32.totalorder %s38_s19, 4   ;;  %s3218_s27 = smov %s2600_s28 }
 0x992   : > { %s3219_s28 = smov %s2604_s29  ;;  %s3220_s29 = smov %s2882_s23 }
 0x993   : > { %s3221_s30 = smov %s2612_s0  ;;  %37 = sbr.rel (!%p35_p13) target bundleno = 25 (0x19), region = 185 }
 0x996   : > { %s3222_s0 = smov %s3217_s24 }
 0x998   :  { %1784 = vsyncpa [#allocation6], 1 }
 0x999   :  { %1786 = vsyncpa [#allocation6 + $0x1], 1 }
 0x99a   :  { %1787 = vsyncpa [#allocation9], 1 }
 0x99b   :  { %1788 = vsyncpa [#allocation12], 1 }
 0x99c   :  { %1789 = vsyncpa [#allocation15], 1 }
 0x99d   :  { %1790 = vsyncpa [#allocation18], 1 }
 0x99e   :  { %1791 = vsyncpa [#allocation7], 1 }
 0x99f   :  { %1793 = vsyncpa [#allocation7 + $0x1], 1 }

</bundles_post_ra>
